<compile_context>
chip_gen: v7x
topology: tpu7x:2x2x1
jax: 0.10.0
libtpu: 0.0.40
codegen_flags: <defaults>
</compile_context>

<pallas_src>
import functools
import math

import jax
import jax.numpy as jnp
from jax import lax
from jax.experimental import pallas as pl
from jax.experimental.pallas import tpu as pltpu

_EPS = 1e-12
_NEG_INF = -1e30  # finite "minus infinity": avoids inf/nan arithmetic in scratch


def _round_up(x, m):
    return (x + m - 1) // m * m


# ---------------------------------------------------------------------------
# in-kernel helpers
# ---------------------------------------------------------------------------

def _tile_is_interior(i, j, tm, tn, b_actual):
    """True if this tile neither touches the diagonal nor the padded tail cols."""
    row_lo = i * tm
    col_lo = j * tn
    hits_diag = jnp.logical_and(row_lo < col_lo + tn, col_lo < row_lo + tm)
    has_pad = col_lo + tn > b_actual
    return jnp.logical_not(jnp.logical_or(hits_diag, has_pad))


def _tile_masks(i, j, tm, tn, b_actual):
    """col-validity mask and (valid & off-diagonal) logits mask for this tile."""
    row_g = i * tm + lax.broadcasted_iota(jnp.int32, (tm, tn), 0)
    col_g = j * tn + lax.broadcasted_iota(jnp.int32, (tm, tn), 1)
    col_valid = col_g < b_actual
    logits_mask = jnp.logical_and(col_valid, row_g != col_g)
    return col_valid, logits_mask


def _online_ml_update(adc, m_sc, l_sc, logits_mask, col_valid):
    """Streaming max / exp-sum update.  Masks may be None (interior fast path).

    Returns (m_prev, m_new, shifted=adc - m_new); updates m_sc and l_sc.
    The running max matches the reference (includes the diagonal, excludes
    padded columns)."""
    m_prev = m_sc[...]
    for_max = adc if col_valid is None else jnp.where(col_valid, adc, _NEG_INF)
    m_new = jnp.maximum(m_prev, jnp.max(for_max, axis=1, keepdims=True))
    alpha = jnp.exp(m_prev - m_new)
    shifted = adc - m_new
    p = jnp.exp(shifted)
    if logits_mask is not None:
        p = jnp.where(logits_mask, p, 0.0)
    l_sc[...] = l_sc[...] * alpha + jnp.sum(p, axis=1, keepdims=True)
    m_sc[...] = m_new
    return m_prev, m_new, shifted


# ---------------------------------------------------------------------------
# kernels
# ---------------------------------------------------------------------------

def _supcon_labels_kernel(feat_ref, featT_ref, labr_ref, labc_ref, out_ref,
                          m_sc, l_sc, num_sc, cnt_sc,
                          *, inv_temp, b_actual, tm, tn, resident):
    """Labels / eye path: positives mask is built in-kernel from int32 labels."""
    i = pl.program_id(0)
    j = pl.program_id(1)

    @pl.when(j == 0)
    def _():
        m_sc[...] = jnp.full_like(m_sc, _NEG_INF)
        l_sc[...] = jnp.zeros_like(l_sc)
        num_sc[...] = jnp.zeros_like(num_sc)
        cnt_sc[...] = jnp.zeros_like(cnt_sc)

    if resident:
        col0 = pl.multiple_of(j * tn, 128)
        fT = featT_ref[:, pl.ds(col0, tn)]          # VMEM-resident contrast slab
    else:
        fT = featT_ref[...]                         # streamed [D_pad, tn] tile

    # [TM, D] x [D, TN] on the MXU (f32 accumulation).
    adc = jnp.dot(feat_ref[...], fT, preferred_element_type=jnp.float32) * inv_temp
    eq = labr_ref[...] == labc_ref[...]             # (TM,1)==(1,TN) -> (TM,TN)

    def update(logits_mask, col_valid):
        m_prev, m_new, shifted = _online_ml_update(adc, m_sc, l_sc,
                                                   logits_mask, col_valid)
        pos = eq if logits_mask is None else jnp.logical_and(eq, logits_mask)
        # stable numerator: accumulate sum(pos * (adc - m_running)) with the
        # same alpha-style rescaling as the exp-sum (uses the PRE-update count).
        num_sc[...] = (num_sc[...] + cnt_sc[...] * (m_prev - m_new)
                       + jnp.sum(jnp.where(pos, shifted, 0.0), axis=1,
                                 keepdims=True))
        cnt_sc[...] = cnt_sc[...] + jnp.sum(pos.astype(jnp.float32), axis=1,
                                            keepdims=True)

    interior = _tile_is_interior(i, j, tm, tn, b_actual)

    @pl.when(interior)
    def _():                                        # fast path: no masks at all
        update(None, None)

    @pl.when(jnp.logical_not(interior))
    def _():                                        # diagonal / padded-tail tiles
        col_valid, logits_mask = _tile_masks(i, j, tm, tn, b_actual)
        update(logits_mask, col_valid)

    @pl.when(j == pl.num_programs(1) - 1)
    def _():
        log_den = jnp.log(l_sc[...] + _EPS)
        s = num_sc[...] - cnt_sc[...] * log_den
        out_ref[...] = s * pl.reciprocal(cnt_sc[...] + _EPS, approx=False)


def _supcon_mask_kernel(feat_ref, featT_ref, mask_ref, out_ref,
                        m_sc, l_sc, num_sc, cnt_sc, den_sc,
                        *, inv_temp, b_actual, tm, tn, resident):
    """Explicit user-provided (possibly non-binary) mask path."""
    i = pl.program_id(0)
    j = pl.program_id(1)

    @pl.when(j == 0)
    def _():
        m_sc[...] = jnp.full_like(m_sc, _NEG_INF)
        l_sc[...] = jnp.zeros_like(l_sc)
        num_sc[...] = jnp.zeros_like(num_sc)
        cnt_sc[...] = jnp.zeros_like(cnt_sc)
        den_sc[...] = jnp.zeros_like(den_sc)

    if resident:
        col0 = pl.multiple_of(j * tn, 128)
        fT = featT_ref[:, pl.ds(col0, tn)]
    else:
        fT = featT_ref[...]

    adc = jnp.dot(feat_ref[...], fT, preferred_element_type=jnp.float32) * inv_temp
    mval = mask_ref[...].astype(jnp.float32)        # mask streamed at low precision

    def update(logits_mask, col_valid):
        m_prev, m_new, shifted = _online_ml_update(adc, m_sc, l_sc,
                                                   logits_mask, col_valid)
        # interior tiles: off-diagonal by construction, and the wrapper
        # zero-pads the mask, so no masking of mval is needed there.
        mpos = mval if logits_mask is None else jnp.where(logits_mask, mval, 0.0)
        mlab = jnp.where(mpos > 0, 1.0, mpos)       # torch.where(mask>0, 1, mask)
        num_sc[...] = (num_sc[...] + cnt_sc[...] * (m_prev - m_new)
                       + jnp.sum(mpos * shifted, axis=1, keepdims=True))
        cnt_sc[...] = cnt_sc[...] + jnp.sum(mpos, axis=1, keepdims=True)
        den_sc[...] = den_sc[...] + jnp.sum(mlab, axis=1, keepdims=True)

    interior = _tile_is_interior(i, j, tm, tn, b_actual)

    @pl.when(interior)
    def _():
        update(None, None)

    @pl.when(jnp.logical_not(interior))
    def _():
        col_valid, logits_mask = _tile_masks(i, j, tm, tn, b_actual)
        update(logits_mask, col_valid)

    @pl.when(j == pl.num_programs(1) - 1)
    def _():
        log_den = jnp.log(l_sc[...] + _EPS)
        s = num_sc[...] - cnt_sc[...] * log_den
        out_ref[...] = s * pl.reciprocal(den_sc[...] + _EPS, approx=False)


# ---------------------------------------------------------------------------
# wrapper
# ---------------------------------------------------------------------------

def _maybe_buffered_spec(shape, index_map, nbuf):
    """BlockSpec with an optional deeper pipeline (best-effort, API-tolerant)."""
    if nbuf and nbuf != 2 and hasattr(pl, "Buffered"):
        try:
            return pl.BlockSpec(shape, index_map, pipeline_mode=pl.Buffered(nbuf))
        except TypeError:
            pass
    return pl.BlockSpec(shape, index_map)


def _plan(B, D, block_m, block_n, itemsize, has_mask, mask_itemsize, budget):
    """Pick tile sizes, paddings, fT residency and the estimated VMEM footprint."""
    b128 = _round_up(B, 128)
    tm = min(int(block_m), b128)
    tn = min(int(block_n), b128)
    # v7x has 2 TensorCores: make sure the "parallel" row axis has >= 2 tiles.
    if b128 // tm < 2 and b128 >= 256:
        tm = 128
    D_pad = _round_up(D, 128)

    def b_pad(tm_, tn_):
        return _round_up(B, math.lcm(tm_, tn_))

    def footprint(tm_, tn_, resident, fT_bufs):
        bp = b_pad(tm_, tn_)
        f = 2 * tm_ * D_pad * itemsize                 # feat stripe, double-buffered
        if resident:
            f += 2 * bp * D_pad * itemsize             # resident fT (conservative x2)
        else:
            f += fT_bufs * D_pad * tn_ * itemsize      # streamed fT tiles
        if has_mask:
            f += 2 * tm_ * tn_ * mask_itemsize         # streamed mask tiles
        f += 6 * tm_ * tn_ * 4                         # f32 elementwise temporaries
        f += 16 * tm_ * 4 + 4 * tn_ * 4                # scratch / label / out vectors
        return f

    resident = footprint(tm, tn, True, 0) <= budget
    fT_bufs = 2
    if not resident:
        fT_bufs = 3 if footprint(tm, tn, False, 3) <= budget else 2
        while footprint(tm, tn, False, fT_bufs) > budget and max(tm, tn) > 128:
            if tn >= tm and tn > 128:
                tn = max(128, (tn // 2) // 128 * 128)
            else:
                tm = max(128, (tm // 2) // 128 * 128)
        # TODO(synk): K-tile the contraction if D_pad alone still busts the budget.
    fp = footprint(tm, tn, resident, fT_bufs)
    return tm, tn, D_pad, b_pad(tm, tn), resident, fT_bufs, fp


def supcon_loss(features, labels=None, mask=None, temperature=0.07, *,
                block_m=256, block_n=256, mxu_dtype=jnp.bfloat16,
                mask_dtype=jnp.bfloat16, vmem_budget_bytes=None):
    """JAX wrapper mirroring SupConLoss.forward.

    Defaults to bf16 MXU operands (f32 accumulation); L2-normalize features (as
    in standard SupCon) for best bf16 accuracy, or pass mxu_dtype=jnp.float32.
    Explicit masks are streamed at `mask_dtype` (bf16 default; pass jnp.float32
    for exact non-binary mask weights)."""
    if features.ndim < 2:
        raise ValueError("`features` needs to be [bsz, ...], >= 2 dims required")
    if features.ndim > 2:
        features = features.reshape(features.shape[0], -1)
    if labels is not None and mask is not None:
        raise ValueError("Cannot define both `labels` and `mask`")

    B, D = features.shape
    assert block_m % 128 == 0 and block_n % 128 == 0, \
        "block_m / block_n must be multiples of 128"

    itemsize = jnp.dtype(mxu_dtype).itemsize
    has_mask = mask is not None
    mask_itemsize = jnp.dtype(mask_dtype).itemsize if has_mask else 0

    # VMEM budget (v5e/v6e: 128 MiB physical, v7x: 64 MiB).
    try:
        physical = int(getattr(pltpu.get_tpu_info(), "vmem_capacity_bytes",
                               64 << 20))
    except Exception:
        physical = 64 << 20
    budget = (int(0.70 * physical) if vmem_budget_bytes is None
              else int(vmem_budget_bytes))

    tm, tn, D_pad, B_pad, resident, fT_bufs, footprint = _plan(
        B, D, block_m, block_n, itemsize, has_mask, mask_itemsize, budget)

    # Zero-pad features; pass the contrast operand pre-transposed (HBM-side).
    f = jnp.zeros((B_pad, D_pad), mxu_dtype).at[:B, :D].set(
        features.astype(mxu_dtype))
    fT = f.T

    grid = (B_pad // tm, B_pad // tn)
    inv_temp = float(1.0 / temperature)

    feat_spec = pl.BlockSpec((tm, D_pad), lambda i, j: (i, 0))
    if resident:
        # Full-array block with a constant index map -> DMA'd once, held in VMEM.
        featT_spec = pl.BlockSpec((D_pad, B_pad), lambda i, j: (0, 0))
    else:
        featT_spec = _maybe_buffered_spec((D_pad, tn), lambda i, j: (0, j),
                                          fT_bufs)
    out_spec = pl.BlockSpec((tm, 1), lambda i, j: (i, 0))

    fT_read = B_pad * D_pad * itemsize * (1 if resident else grid[0])
    bytes_accessed = B_pad * D_pad * itemsize + fT_read + B_pad * 4

    if mask is None:
        if labels is None:
            # default path: mask = eye  <=>  every sample is its own class
            labels = jnp.arange(B, dtype=jnp.int32)
        else:
            labels = jnp.asarray(labels).reshape(-1)
            if labels.shape[0] != B:
                raise ValueError("Num of labels does not match num of features")
            labels = labels.astype(jnp.int32)

        lab_r = jnp.full((B_pad, 1), -1, jnp.int32).at[:B, 0].set(labels)
        lab_c = jnp.full((1, B_pad), -2, jnp.int32).at[0, :B].set(labels)

        kernel = functools.partial(_supcon_labels_kernel, inv_temp=inv_temp,
                                   b_actual=B, tm=tm, tn=tn, resident=resident)
        in_specs = [feat_spec, featT_spec,
                    pl.BlockSpec((tm, 1), lambda i, j: (i, 0)),
                    pl.BlockSpec((1, tn), lambda i, j: (0, j))]
        scratch = [pltpu.VMEM((tm, 1), jnp.float32)] * 4
        args = (f, fT, lab_r, lab_c)
        bytes_accessed += 4 * 2 * B_pad
    else:
        mask = jnp.asarray(mask)
        if mask.shape != (B, B):
            raise ValueError("`mask` must have shape [bsz, bsz]")
        mask_p = jnp.zeros((B_pad, B_pad), mask_dtype).at[:B, :B].set(
            mask.astype(mask_dtype))
        kernel = functools.partial(_supcon_mask_kernel, inv_temp=inv_temp,
                                   b_actual=B, tm=tm, tn=tn, resident=resident)
        in_specs = [feat_spec, featT_spec,
                    pl.BlockSpec((tm, tn), lambda i, j: (i, j))]
        scratch = [pltpu.VMEM((tm, 1), jnp.float32)] * 5
        args = (f, fT, mask_p)
        bytes_accessed += mask_itemsize * B_pad * B_pad

    vmem_limit = int(max(32 << 20, min(int(physical * 0.9),
                                       footprint + (16 << 20))))

    mlpp = pl.pallas_call(
        kernel,
        out_shape=jax.ShapeDtypeStruct((B_pad, 1), jnp.float32),
        grid_spec=pltpu.PrefetchScalarGridSpec(
            num_scalar_prefetch=0,
            grid=grid,
            in_specs=in_specs,
            out_specs=out_spec,
            scratch_shapes=scratch),
        compiler_params=pltpu.CompilerParams(
            dimension_semantics=("parallel", "arbitrary"),
            vmem_limit_bytes=vmem_limit),
        cost_estimate=pl.CostEstimate(
            flops=int(2 * B_pad * B_pad * D_pad),
            transcendentals=int(B_pad * B_pad),
            bytes_accessed=int(bytes_accessed)),
    )(*args)

    # loss = -mean over real rows of mean_log_prob_pos
    return -jnp.sum(mlpp[:B, 0]) / B


# ---------------------------------------------------------------------------
# pure-JAX reference + tests
# ---------------------------------------------------------------------------

def _supcon_loss_ref(features, labels=None, mask=None, temperature=0.07):
    """Pure-JAX reference: direct transcription of the torch forward."""
    if features.ndim > 2:
        features = features.reshape(features.shape[0], -1)
    b = features.shape[0]
    if labels is None and mask is None:
        mask = jnp.eye(b, dtype=jnp.float32)
    elif labels is not None:
        labels = labels.reshape(-1, 1)
        mask = jnp.equal(labels, labels.T).astype(jnp.float32)
    else:
        mask = mask.astype(jnp.float32)
    f = features.astype(jnp.float32)
    adc = (f @ f.T) / temperature
    logits = adc - jnp.max(adc, axis=1, keepdims=True)
    logits_mask = 1.0 - jnp.eye(b, dtype=jnp.float32)
    mask = mask * logits_mask
    exp_logits = jnp.exp(logits) * logits_mask
    log_prob = logits - jnp.log(jnp.sum(exp_logits, axis=1, keepdims=True) + 1e-12)
    mask_labels = jnp.where(mask > 0, jnp.ones_like(mask), mask)
    mlpp = jnp.sum(mask * log_prob, axis=1) / (jnp.sum(mask_labels, axis=1) + 1e-12)
    return -jnp.mean(mlpp)


if __name__ == "__main__":
    key = jax.random.PRNGKey(0)
    k1, k2, k3, k4 = jax.random.split(key, 4)

    # ---- small shapes consistent with the module: [bsz, hidden] ----
    B, D = 8, 32
    features = jax.random.normal(k1, (B, D), dtype=jnp.float32)
    labels = jax.random.randint(k2, (B,), 0, 3)

    # 1) labels path (supervised contrastive), f32 MXU for tight tolerance
    loss = jax.block_until_ready(
        supcon_loss(features, labels=labels, mxu_dtype=jnp.float32))
    ref = _supcon_loss_ref(features, labels=labels)
    assert jnp.allclose(loss, ref, rtol=1e-4, atol=1e-3), (loss, ref)

    # 2) default path (mask = eye -> degenerate case, loss == 0)
    loss2 = jax.block_until_ready(supcon_loss(features, mxu_dtype=jnp.float32))
    ref2 = _supcon_loss_ref(features)
    assert jnp.allclose(loss2, ref2, rtol=1e-4, atol=1e-3), (loss2, ref2)

    # 3) explicit mask path (same positives as labels path), f32 mask stream
    mask = (labels.reshape(-1, 1) == labels.reshape(1, -1)).astype(jnp.float32)
    loss3 = jax.block_until_ready(
        supcon_loss(features, mask=mask, mxu_dtype=jnp.float32,
                    mask_dtype=jnp.float32))
    assert jnp.allclose(loss3, ref, rtol=1e-4, atol=1e-3), (loss3, ref)

    # 4) multi-tile streaming path (grid 2x2): exercises the online softmax,
    #    the interior fast path, the padded-tail slow path and resident fT.
    B2, D2 = 200, 48
    features2 = jax.random.normal(k3, (B2, D2), dtype=jnp.float32)
    labels2 = jax.random.randint(k4, (B2,), 0, 7)
    ref4 = _supcon_loss_ref(features2, labels=labels2)
    loss4 = jax.block_until_ready(
        supcon_loss(features2, labels=labels2, block_m=128, block_n=128,
                    mxu_dtype=jnp.float32))
    assert jnp.allclose(loss4, ref4, rtol=1e-4, atol=1e-3), (loss4, ref4)

    # 5) same shapes, but force the streamed (non-resident) fT fallback path
    loss5 = jax.block_until_ready(
        supcon_loss(features2, labels=labels2, block_m=128, block_n=128,
                    mxu_dtype=jnp.float32, vmem_budget_bytes=512 * 1024))
    assert jnp.allclose(loss5, ref4, rtol=1e-4, atol=1e-3), (loss5, ref4)

    # 6) bf16 default MXU operands (f32 accumulation) on L2-normalized features
    featn = features2 / jnp.linalg.norm(features2, axis=1, keepdims=True)
    ref6 = _supcon_loss_ref(featn, labels=labels2)
    loss6 = jax.block_until_ready(
        supcon_loss(featn, labels=labels2, block_m=128, block_n=128))
    assert jnp.allclose(loss6, ref6, rtol=5e-2, atol=1e-1), (loss6, ref6)

    # 7) bf16-streamed explicit mask path, multi-tile
    mask2 = (labels2.reshape(-1, 1) == labels2.reshape(1, -1)).astype(jnp.float32)
    loss7 = jax.block_until_ready(
        supcon_loss(featn, mask=mask2, block_m=128, block_n=128))
    assert jnp.allclose(loss7, ref6, rtol=5e-2, atol=1e-1), (loss7, ref6)

    print("KERNEL_OK")
</pallas_src>

<mosaic_0001>
module attributes {stable_mosaic.version = 11 : i64} {
  func.func @_supcon_labels_kernel(%arg0: i32, %arg1: i32, %arg2: memref<128x128xf32, #tpu.memory_space<vmem>>, %arg3: memref<128x128xf32, #tpu.memory_space<vmem>>, %arg4: memref<128x1xi32, #tpu.memory_space<vmem>>, %arg5: memref<1x128xi32, #tpu.memory_space<vmem>>, %arg6: memref<128x1xf32, #tpu.memory_space<vmem>>, %arg7: memref<128x1xf32, #tpu.memory_space<vmem>>, %arg8: memref<128x1xf32, #tpu.memory_space<vmem>>, %arg9: memref<128x1xf32, #tpu.memory_space<vmem>>, %arg10: memref<128x1xf32, #tpu.memory_space<vmem>>) attributes {dimension_semantics = [#tpu.dimension_semantics<parallel>, #tpu.dimension_semantics<arbitrary>], iteration_bounds = array<i64: 1, 1>, scalar_prefetch = 0 : i64, scratch_operands = 4 : i64, tpu.core_type = #tpu.core_type<tc>, window_params = [{transform_indices = @transform_0, window_bounds = array<i64: 128, 128>}, {pipeline_mode = #tpu.pipeline_mode<synchronous>, transform_indices = @transform_1, window_bounds = array<i64: 128, 128>}, {transform_indices = @transform_2, window_bounds = array<i64: 128, 1>}, {transform_indices = @transform_3, window_bounds = array<i64: 1, 128>}, {transform_indices = @transform_4, window_bounds = array<i64: 128, 1>}]} {
    %c0_i32 = arith.constant 0 : i32
    %0 = arith.cmpi eq, %arg1, %c0_i32 : i32
    %1 = arith.extui %0 : i1 to i32
    %c0_i32_0 = arith.constant 0 : i32
    %2 = arith.cmpi ne, %1, %c0_i32_0 : i32
    scf.if %2 {
      %cst_18 = arith.constant -1.000000e+30 : f32
      %35 = vector.broadcast %cst_18 : f32 to vector<128x1xf32>
      %c0_19 = arith.constant 0 : index
      %c0_20 = arith.constant 0 : index
      %36 = vector.load %arg7[%c0_19, %c0_20] : memref<128x1xf32, #tpu.memory_space<vmem>>, vector<128x1xf32>
      tpu.vector_store %arg7[%c0_19, %c0_20], %35 {strides = array<i32>} : memref<128x1xf32, #tpu.memory_space<vmem>>, vector<128x1xf32>,
      %cst_21 = arith.constant 0.000000e+00 : f32
      %37 = vector.broadcast %cst_21 : f32 to vector<128x1xf32>
      %c0_22 = arith.constant 0 : index
      %c0_23 = arith.constant 0 : index
      %38 = vector.load %arg8[%c0_22, %c0_23] : memref<128x1xf32, #tpu.memory_space<vmem>>, vector<128x1xf32>
      tpu.vector_store %arg8[%c0_22, %c0_23], %37 {strides = array<i32>} : memref<128x1xf32, #tpu.memory_space<vmem>>, vector<128x1xf32>,
      %cst_24 = arith.constant 0.000000e+00 : f32
      %39 = vector.broadcast %cst_24 : f32 to vector<128x1xf32>
      %c0_25 = arith.constant 0 : index
      %c0_26 = arith.constant 0 : index
      %40 = vector.load %arg9[%c0_25, %c0_26] : memref<128x1xf32, #tpu.memory_space<vmem>>, vector<128x1xf32>
      tpu.vector_store %arg9[%c0_25, %c0_26], %39 {strides = array<i32>} : memref<128x1xf32, #tpu.memory_space<vmem>>, vector<128x1xf32>,
      %cst_27 = arith.constant 0.000000e+00 : f32
      %41 = vector.broadcast %cst_27 : f32 to vector<128x1xf32>
      %c0_28 = arith.constant 0 : index
      %c0_29 = arith.constant 0 : index
      %42 = vector.load %arg10[%c0_28, %c0_29] : memref<128x1xf32, #tpu.memory_space<vmem>>, vector<128x1xf32>
      tpu.vector_store %arg10[%c0_28, %c0_29], %41 {strides = array<i32>} : memref<128x1xf32, #tpu.memory_space<vmem>>, vector<128x1xf32>,
    } else {
    }
    %c128_i32 = arith.constant 128 : i32
    %3 = arith.muli %arg1, %c128_i32 : i32
    %4 = tpu.assume_multiple %3, 128 : i32
    %c0 = arith.constant 0 : index
    %5 = arith.index_cast %4 : i32 to index
    %6 = vector.load %arg3[%c0, %5] : memref<128x128xf32, #tpu.memory_space<vmem>>, vector<128x128xf32>
    %c0_1 = arith.constant 0 : index
    %c0_2 = arith.constant 0 : index
    %7 = vector.load %arg2[%c0_1, %c0_2] : memref<128x128xf32, #tpu.memory_space<vmem>>, vector<128x128xf32>
    %cst = arith.constant dense<0.000000e+00> : vector<128x128xf32>
    %8 = tpu.matmul %7, %6, %cst {dimension_numbers = #tpu.dot_dimension_numbers<[1], [0], [0], [1], [0, 0, 1, 1], [], []>} : vector<128x128xf32>, vector<128x128xf32>, vector<128x128xf32> -> vector<128x128xf32>
    %cst_3 = arith.constant 14.2857141 : f32
    %9 = vector.broadcast %cst_3 : f32 to vector<128x128xf32>
    %10 = arith.mulf %8, %9 : vector<128x128xf32>
    %c0_4 = arith.constant 0 : index
    %c0_5 = arith.constant 0 : index
    %11 = vector.load %arg4[%c0_4, %c0_5] : memref<128x1xi32, #tpu.memory_space<vmem>>, vector<128x1xi32>
    %c0_6 = arith.constant 0 : index
    %c0_7 = arith.constant 0 : index
    %12 = vector.load %arg5[%c0_6, %c0_7] : memref<1x128xi32, #tpu.memory_space<vmem>>, vector<1x128xi32>
    %13 = vector.broadcast %11 : vector<128x1xi32> to vector<128x128xi32>
    %14 = vector.broadcast %12 : vector<1x128xi32> to vector<128x128xi32>
    %15 = arith.cmpi eq, %13, %14 : vector<128x128xi32>
    %c128_i32_8 = arith.constant 128 : i32
    %16 = arith.muli %arg0, %c128_i32_8 : i32
    %c128_i32_9 = arith.constant 128 : i32
    %17 = arith.muli %arg1, %c128_i32_9 : i32
    %c128_i32_10 = arith.constant 128 : i32
    %18 = arith.addi %17, %c128_i32_10 : i32
    %19 = arith.cmpi slt, %16, %18 : i32
    %c128_i32_11 = arith.constant 128 : i32
    %20 = arith.addi %16, %c128_i32_11 : i32
    %21 = arith.cmpi slt, %17, %20 : i32
    %22 = arith.andi %19, %21 : i1
    %c128_i32_12 = arith.constant 128 : i32
    %23 = arith.addi %17, %c128_i32_12 : i32
    %c8_i32 = arith.constant 8 : i32
    %24 = arith.cmpi sgt, %23, %c8_i32 : i32
    %25 = arith.ori %22, %24 : i1
    %true = arith.constant true
    %26 = arith.xori %25, %true : i1
    %27 = arith.extui %26 : i1 to i32
    %c0_i32_13 = arith.constant 0 : i32
    %28 = arith.cmpi ne, %27, %c0_i32_13 : i32
    scf.if %28 {
      %c0_18 = arith.constant 0 : index
      %c0_19 = arith.constant 0 : index
      %35 = vector.load %arg7[%c0_18, %c0_19] : memref<128x1xf32, #tpu.memory_space<vmem>>, vector<128x1xf32>
      %cst_20 = arith.constant dense<0xFF800000> : vector<128xf32>
      %36 = vector.multi_reduction <maximumf>, %10, %cst_20 [1] : vector<128x128xf32> to vector<128xf32>
      %37 = vector.shape_cast %36 : vector<128xf32> to vector<128x1xf32>
      %38 = arith.maximumf %35, %37 : vector<128x1xf32>
      %39 = arith.subf %35, %38 : vector<128x1xf32>
      %40 = math.exp %39 : vector<128x1xf32>
      %41 = vector.broadcast %38 : vector<128x1xf32> to vector<128x128xf32>
      %42 = arith.subf %10, %41 : vector<128x128xf32>
      %43 = math.exp %42 : vector<128x128xf32>
      %c0_21 = arith.constant 0 : index
      %c0_22 = arith.constant 0 : index
      %44 = vector.load %arg8[%c0_21, %c0_22] : memref<128x1xf32, #tpu.memory_space<vmem>>, vector<128x1xf32>
      %45 = arith.mulf %44, %40 : vector<128x1xf32>
      %cst_23 = arith.constant dense<0.000000e+00> : vector<128xf32>
      %46 = vector.multi_reduction <add>, %43, %cst_23 [1] : vector<128x128xf32> to vector<128xf32>
      %47 = vector.shape_cast %46 : vector<128xf32> to vector<128x1xf32>
      %48 = arith.addf %45, %47 : vector<128x1xf32>
      %c0_24 = arith.constant 0 : index
      %c0_25 = arith.constant 0 : index
      %49 = vector.load %arg8[%c0_24, %c0_25] : memref<128x1xf32, #tpu.memory_space<vmem>>, vector<128x1xf32>
      tpu.vector_store %arg8[%c0_24, %c0_25], %48 {strides = array<i32>} : memref<128x1xf32, #tpu.memory_space<vmem>>, vector<128x1xf32>,
      %c0_26 = arith.constant 0 : index
      %c0_27 = arith.constant 0 : index
      %50 = vector.load %arg7[%c0_26, %c0_27] : memref<128x1xf32, #tpu.memory_space<vmem>>, vector<128x1xf32>
      tpu.vector_store %arg7[%c0_26, %c0_27], %38 {strides = array<i32>} : memref<128x1xf32, #tpu.memory_space<vmem>>, vector<128x1xf32>,
      %c0_28 = arith.constant 0 : index
      %c0_29 = arith.constant 0 : index
      %51 = vector.load %arg9[%c0_28, %c0_29] : memref<128x1xf32, #tpu.memory_space<vmem>>, vector<128x1xf32>
      %c0_30 = arith.constant 0 : index
      %c0_31 = arith.constant 0 : index
      %52 = vector.load %arg10[%c0_30, %c0_31] : memref<128x1xf32, #tpu.memory_space<vmem>>, vector<128x1xf32>
      %53 = arith.subf %35, %38 : vector<128x1xf32>
      %54 = arith.mulf %52, %53 : vector<128x1xf32>
      %55 = arith.addf %51, %54 : vector<128x1xf32>
      %cst_32 = arith.constant 0.000000e+00 : f32
      %56 = vector.broadcast %cst_32 : f32 to vector<128x128xf32>
      %57 = arith.select %15, %42, %56 : vector<128x128xi1>, vector<128x128xf32>
      %cst_33 = arith.constant dense<0.000000e+00> : vector<128xf32>
      %58 = vector.multi_reduction <add>, %57, %cst_33 [1] : vector<128x128xf32> to vector<128xf32>
      %59 = vector.shape_cast %58 : vector<128xf32> to vector<128x1xf32>
      %60 = arith.addf %55, %59 : vector<128x1xf32>
      %c0_34 = arith.constant 0 : index
      %c0_35 = arith.constant 0 : index
      %61 = vector.load %arg9[%c0_34, %c0_35] : memref<128x1xf32, #tpu.memory_space<vmem>>, vector<128x1xf32>
      tpu.vector_store %arg9[%c0_34, %c0_35], %60 {strides = array<i32>} : memref<128x1xf32, #tpu.memory_space<vmem>>, vector<128x1xf32>,
      %c0_36 = arith.constant 0 : index
      %c0_37 = arith.constant 0 : index
      %62 = vector.load %arg10[%c0_36, %c0_37] : memref<128x1xf32, #tpu.memory_space<vmem>>, vector<128x1xf32>
      %63 = arith.extui %15 : vector<128x128xi1> to vector<128x128xi32>
      %64 = arith.sitofp %63 : vector<128x128xi32> to vector<128x128xf32>
      %cst_38 = arith.constant dense<0.000000e+00> : vector<128xf32>
      %65 = vector.multi_reduction <add>, %64, %cst_38 [1] : vector<128x128xf32> to vector<128xf32>
      %66 = vector.shape_cast %65 : vector<128xf32> to vector<128x1xf32>
      %67 = arith.addf %62, %66 : vector<128x1xf32>
      %c0_39 = arith.constant 0 : index
      %c0_40 = arith.constant 0 : index
      %68 = vector.load %arg10[%c0_39, %c0_40] : memref<128x1xf32, #tpu.memory_space<vmem>>, vector<128x1xf32>
      tpu.vector_store %arg10[%c0_39, %c0_40], %67 {strides = array<i32>} : memref<128x1xf32, #tpu.memory_space<vmem>>, vector<128x1xf32>,
    } else {
    }
    %true_14 = arith.constant true
    %29 = arith.xori %26, %true_14 : i1
    %30 = arith.extui %29 : i1 to i32
    %c0_i32_15 = arith.constant 0 : i32
    %31 = arith.cmpi ne, %30, %c0_i32_15 : i32
    scf.if %31 {
      %c128_i32_18 = arith.constant 128 : i32
      %35 = arith.muli %arg0, %c128_i32_18 : i32
      %36 = tpu.iota {dimensions = array<i32: 0>} : vector<128x128xi32>
      %37 = vector.broadcast %35 : i32 to vector<128x128xi32>
      %38 = arith.addi %37, %36 : vector<128x128xi32>
      %c128_i32_19 = arith.constant 128 : i32
      %39 = arith.muli %arg1, %c128_i32_19 : i32
      %40 = tpu.iota {dimensions = array<i32: 1>} : vector<128x128xi32>
      %41 = vector.broadcast %39 : i32 to vector<128x128xi32>
      %42 = arith.addi %41, %40 : vector<128x128xi32>
      %c8_i32_20 = arith.constant 8 : i32
      %43 = vector.broadcast %c8_i32_20 : i32 to vector<128x128xi32>
      %44 = arith.cmpi slt, %42, %43 : vector<128x128xi32>
      %45 = arith.cmpi ne, %38, %42 : vector<128x128xi32>
      %46 = arith.andi %44, %45 : vector<128x128xi1>
      %c0_21 = arith.constant 0 : index
      %c0_22 = arith.constant 0 : index
      %47 = vector.load %arg7[%c0_21, %c0_22] : memref<128x1xf32, #tpu.memory_space<vmem>>, vector<128x1xf32>
      %cst_23 = arith.constant -1.000000e+30 : f32
      %48 = vector.broadcast %cst_23 : f32 to vector<128x128xf32>
      %49 = arith.select %44, %10, %48 : vector<128x128xi1>, vector<128x128xf32>
      %cst_24 = arith.constant dense<0xFF800000> : vector<128xf32>
      %50 = vector.multi_reduction <maximumf>, %49, %cst_24 [1] : vector<128x128xf32> to vector<128xf32>
      %51 = vector.shape_cast %50 : vector<128xf32> to vector<128x1xf32>
      %52 = arith.maximumf %47, %51 : vector<128x1xf32>
      %53 = arith.subf %47, %52 : vector<128x1xf32>
      %54 = math.exp %53 : vector<128x1xf32>
      %55 = vector.broadcast %52 : vector<128x1xf32> to vector<128x128xf32>
      %56 = arith.subf %10, %55 : vector<128x128xf32>
      %57 = math.exp %56 : vector<128x128xf32>
      %cst_25 = arith.constant 0.000000e+00 : f32
      %58 = vector.broadcast %cst_25 : f32 to vector<128x128xf32>
      %59 = arith.select %46, %57, %58 : vector<128x128xi1>, vector<128x128xf32>
      %c0_26 = arith.constant 0 : index
      %c0_27 = arith.constant 0 : index
      %60 = vector.load %arg8[%c0_26, %c0_27] : memref<128x1xf32, #tpu.memory_space<vmem>>, vector<128x1xf32>
      %61 = arith.mulf %60, %54 : vector<128x1xf32>
      %cst_28 = arith.constant dense<0.000000e+00> : vector<128xf32>
      %62 = vector.multi_reduction <add>, %59, %cst_28 [1] : vector<128x128xf32> to vector<128xf32>
      %63 = vector.shape_cast %62 : vector<128xf32> to vector<128x1xf32>
      %64 = arith.addf %61, %63 : vector<128x1xf32>
      %c0_29 = arith.constant 0 : index
      %c0_30 = arith.constant 0 : index
      %65 = vector.load %arg8[%c0_29, %c0_30] : memref<128x1xf32, #tpu.memory_space<vmem>>, vector<128x1xf32>
      tpu.vector_store %arg8[%c0_29, %c0_30], %64 {strides = array<i32>} : memref<128x1xf32, #tpu.memory_space<vmem>>, vector<128x1xf32>,
      %c0_31 = arith.constant 0 : index
      %c0_32 = arith.constant 0 : index
      %66 = vector.load %arg7[%c0_31, %c0_32] : memref<128x1xf32, #tpu.memory_space<vmem>>, vector<128x1xf32>
      tpu.vector_store %arg7[%c0_31, %c0_32], %52 {strides = array<i32>} : memref<128x1xf32, #tpu.memory_space<vmem>>, vector<128x1xf32>,
      %67 = arith.andi %15, %46 : vector<128x128xi1>
      %c0_33 = arith.constant 0 : index
      %c0_34 = arith.constant 0 : index
      %68 = vector.load %arg9[%c0_33, %c0_34] : memref<128x1xf32, #tpu.memory_space<vmem>>, vector<128x1xf32>
      %c0_35 = arith.constant 0 : index
      %c0_36 = arith.constant 0 : index
      %69 = vector.load %arg10[%c0_35, %c0_36] : memref<128x1xf32, #tpu.memory_space<vmem>>, vector<128x1xf32>
      %70 = arith.subf %47, %52 : vector<128x1xf32>
      %71 = arith.mulf %69, %70 : vector<128x1xf32>
      %72 = arith.addf %68, %71 : vector<128x1xf32>
      %cst_37 = arith.constant 0.000000e+00 : f32
      %73 = vector.broadcast %cst_37 : f32 to vector<128x128xf32>
      %74 = arith.select %67, %56, %73 : vector<128x128xi1>, vector<128x128xf32>
      %cst_38 = arith.constant dense<0.000000e+00> : vector<128xf32>
      %75 = vector.multi_reduction <add>, %74, %cst_38 [1] : vector<128x128xf32> to vector<128xf32>
      %76 = vector.shape_cast %75 : vector<128xf32> to vector<128x1xf32>
      %77 = arith.addf %72, %76 : vector<128x1xf32>
      %c0_39 = arith.constant 0 : index
      %c0_40 = arith.constant 0 : index
      %78 = vector.load %arg9[%c0_39, %c0_40] : memref<128x1xf32, #tpu.memory_space<vmem>>, vector<128x1xf32>
      tpu.vector_store %arg9[%c0_39, %c0_40], %77 {strides = array<i32>} : memref<128x1xf32, #tpu.memory_space<vmem>>, vector<128x1xf32>,
      %c0_41 = arith.constant 0 : index
      %c0_42 = arith.constant 0 : index
      %79 = vector.load %arg10[%c0_41, %c0_42] : memref<128x1xf32, #tpu.memory_space<vmem>>, vector<128x1xf32>
      %80 = arith.extui %67 : vector<128x128xi1> to vector<128x128xi32>
      %81 = arith.sitofp %80 : vector<128x128xi32> to vector<128x128xf32>
      %cst_43 = arith.constant dense<0.000000e+00> : vector<128xf32>
      %82 = vector.multi_reduction <add>, %81, %cst_43 [1] : vector<128x128xf32> to vector<128xf32>
      %83 = vector.shape_cast %82 : vector<128xf32> to vector<128x1xf32>
      %84 = arith.addf %79, %83 : vector<128x1xf32>
      %c0_44 = arith.constant 0 : index
      %c0_45 = arith.constant 0 : index
      %85 = vector.load %arg10[%c0_44, %c0_45] : memref<128x1xf32, #tpu.memory_space<vmem>>, vector<128x1xf32>
      tpu.vector_store %arg10[%c0_44, %c0_45], %84 {strides = array<i32>} : memref<128x1xf32, #tpu.memory_space<vmem>>, vector<128x1xf32>,
    } else {
    }
    %c0_i32_16 = arith.constant 0 : i32
    %32 = arith.cmpi eq, %arg1, %c0_i32_16 : i32
    %33 = arith.extui %32 : i1 to i32
    %c0_i32_17 = arith.constant 0 : i32
    %34 = arith.cmpi ne, %33, %c0_i32_17 : i32
    scf.if %34 {
      %c0_18 = arith.constant 0 : index
      %c0_19 = arith.constant 0 : index
      %35 = vector.load %arg8[%c0_18, %c0_19] : memref<128x1xf32, #tpu.memory_space<vmem>>, vector<128x1xf32>
      %cst_20 = arith.constant 9.99999996E-13 : f32
      %36 = vector.broadcast %cst_20 : f32 to vector<128x1xf32>
      %37 = arith.addf %35, %36 : vector<128x1xf32>
      %38 = math.log %37 : vector<128x1xf32>
      %c0_21 = arith.constant 0 : index
      %c0_22 = arith.constant 0 : index
      %39 = vector.load %arg9[%c0_21, %c0_22] : memref<128x1xf32, #tpu.memory_space<vmem>>, vector<128x1xf32>
      %c0_23 = arith.constant 0 : index
      %c0_24 = arith.constant 0 : index
      %40 = vector.load %arg10[%c0_23, %c0_24] : memref<128x1xf32, #tpu.memory_space<vmem>>, vector<128x1xf32>
      %41 = arith.mulf %40, %38 : vector<128x1xf32>
      %42 = arith.subf %39, %41 : vector<128x1xf32>
      %c0_25 = arith.constant 0 : index
      %c0_26 = arith.constant 0 : index
      %43 = vector.load %arg10[%c0_25, %c0_26] : memref<128x1xf32, #tpu.memory_space<vmem>>, vector<128x1xf32>
      %cst_27 = arith.constant 9.99999996E-13 : f32
      %44 = vector.broadcast %cst_27 : f32 to vector<128x1xf32>
      %45 = arith.addf %43, %44 : vector<128x1xf32>
      %46 = tpu.reciprocal %45 : vector<128x1xf32> -> vector<128x1xf32>
      %47 = arith.mulf %42, %46 : vector<128x1xf32>
      %c0_28 = arith.constant 0 : index
      %c0_29 = arith.constant 0 : index
      %48 = vector.load %arg6[%c0_28, %c0_29] : memref<128x1xf32, #tpu.memory_space<vmem>>, vector<128x1xf32>
      tpu.vector_store %arg6[%c0_28, %c0_29], %47 {strides = array<i32>} : memref<128x1xf32, #tpu.memory_space<vmem>>, vector<128x1xf32>,
    } else {
    }
    return
  }
  func.func @transform_0(%arg0: i32, %arg1: i32) -> (i32, i32) {
    %c0_i32 = arith.constant 0 : i32
    %c0_i32_0 = arith.constant 0 : i32
    return %arg0, %c0_i32 : i32, i32
  }
  func.func @transform_1(%arg0: i32, %arg1: i32) -> (i32, i32) {
    %c0_i32 = arith.constant 0 : i32
    %c0_i32_0 = arith.constant 0 : i32
    %c0_i32_1 = arith.constant 0 : i32
    return %c0_i32, %c0_i32_0 : i32, i32
  }
  func.func @transform_2(%arg0: i32, %arg1: i32) -> (i32, i32) {
    %c0_i32 = arith.constant 0 : i32
    %c0_i32_0 = arith.constant 0 : i32
    return %arg0, %c0_i32 : i32, i32
  }
  func.func @transform_3(%arg0: i32, %arg1: i32) -> (i32, i32) {
    %c0_i32 = arith.constant 0 : i32
    %c0_i32_0 = arith.constant 0 : i32
    return %c0_i32, %arg1 : i32, i32
  }
  func.func @transform_4(%arg0: i32, %arg1: i32) -> (i32, i32) {
    %c0_i32 = arith.constant 0 : i32
    %c0_i32_0 = arith.constant 0 : i32
    return %arg0, %c0_i32 : i32, i32
  }
}

</mosaic_0001>

<bundles_post_ra>
// kernel: tpu_custom_call.1
= control target key start
LH: loop header
LB: loop body
LE: loop exit
PB: predicated region body
PF: predicated region fallthrough
CT: control target
= control target key end

     0   :  { %9 = vsyncpa [#allocation7], 0  ;;  %s2265_s15 = smov [#allocation6]   ;;  %s3331_s0 = inlined_call_operand.vmem [shape: f32[128,128], index: 0, kind: input, shape index: {}]   ;;  %s3332_s1 = inlined_call_operand.hbm [shape: f32[128,128], index: 1, kind: input, shape index: {}]   ;;  %s3333_s2 = inlined_call_operand.vmem [shape: s32[128,1], index: 2, kind: input, shape index: {}]   ;;  %s3334_s3 = inlined_call_operand.vmem [shape: s32[1,128], index: 3, kind: input, shape index: {}]   ;;  %s3335_s4 = inlined_call_operand.vmem [shape: f32[128,1], index: 4, kind: output, shape index: {}]  }
   0x1   :  { %s17_s16 = sshll.u32 %s2265_s15, 4  ;;  %s2241_s19 = scalar_lea.hbm %s3332_s1, 2048  ;;  %s18_s16 = int_to_ptr.vmem [resolvable:$true] %s17_s16 }
   0x2   :  { %p2242_p0 = scmp.ne.s32.totalorder %s3332_s1, %s2241_s19  ;;  %p2245_p1 = scmp.lt.u32.totalorder %s2241_s19, %s3332_s1 }
   0x4   :  { %p2247_p2 = pnand %p2245_p1, %p2242_p0 }
   0x6   :  { %2250 = shalt.err (!%p2247_p2)
}
   0x7   :  { %s2251_s24 = scalar_lea.vmem %s18_s16, 2048  ;;  %p2256_p4 = scmp.lt.s32.totalorder %s18_s16, %s18_s16 }
   0x8   :  { %p2252_p3 = scmp.ne.s32.totalorder %s18_s16, %s2251_s24  ;;  %p2257_p5 = scmp.lt.s32.totalorder %s2251_s24, %s2251_s24 }
   0xa   :  { %p2258_p6 = por %p2257_p5, %p2256_p4 }
   0xc   :  { %p2259_p7 = pnand %p2258_p6, %p2252_p3 }
   0xe   :  { %2262 = shalt.err (!%p2259_p7)
}
   0xf   :  { %s2266_s25 = smov 128   ;;  %s2267_s26 = smov 8  }
  0x10   :  { %23 = dma.hbm_to_vmem [thread:$0]  %s3332_s1, 2048, %s18_s16, [#allocation7], %s2266_s25, %s2266_s25, %s2267_s26  }
  0x11   :  { %2263 = dma.done.wait [#allocation7], 2048  }
  0x12   :  { %2264 = vsyncadd [#allocation7], 4294965248  ;;  %v2268_v0 = vmov 0   ;;  %v104_v1 = vld [vmem:[#allocation6] sm:$0xff]  ;;  %v105_v2 = vld [vmem:[#allocation6 + $0x8] sm:$0xff]  ;;  %v394_v55 = vlaneseq  ;;  %v3375_v59 = vmov 0 }
  0x13   :  { %2111 = vset.pattern.permute.xlu0 %v2268_v0  ;;  %2112 = vset.pattern.permute.xlu1 %v2268_v0  ;;  %v106_v3 = vld [vmem:[#allocation6 + $0x10] sm:$0xff]  ;;  %v2057_v4 = vpack.c.bf16 %v105_v2, %v104_v1  ;;  %v107_v5 = vld [vmem:[#allocation6 + $0x18] sm:$0xff]  ;;  %v108_v7 = vld [vmem:[#allocation6 + $0x20] sm:$0xff]  ;;  %v3336_v62 = vmov 0.0   ;;  %vm3338_vm5 = vcmask 7168  }
  0x14   :  { %v2061_v6 = vpack.c.bf16 %v107_v5, %v106_v3  ;;  %v109_v8 = vld [vmem:[#allocation6 + $0x28] sm:$0xff]  ;;  %v120_v10 = vld [vmem:[%s3331_s0] sm:$0xff]  ;;  %v110_v12 = vld [vmem:[#allocation6 + $0x30] sm:$0xff]  ;;  %v2398_v56 = vand.u32 127, %v394_v55  ;;  %v2400_v57 = vshrl.u32 %v394_v55, 7  ;;  %84 = vst.msk [vmem:[#allocation5] sm:$0xff] %vm3338_vm5, %v3336_v62 }
  0x15   :  { %2058 = vmatprep.subr.bf16.mxu0 %v2057_v4  ;;  %2089 = vmatprep.subr.bf16.mxu1 %v2057_v4  ;;  %v2065_v9 = vpack.c.bf16 %v109_v8, %v108_v7  ;;  %v128_v11 = vld [vmem:[%s3331_s0 + $0x40] sm:$0xff]  ;;  %v111_v13 = vld [vmem:[#allocation6 + $0x38] sm:$0xff]  ;;  %v113_v16 = vld [vmem:[#allocation6 + $0x48] sm:$0xff]  ;;  %52 = vst.msk [vmem:[#allocation3] sm:$0xff] %vm3338_vm5, %v3336_v62  ;;  %v2270_v0 = vmov -1e+30  }
  0x16   :  { %2060 = vmatpush3.bf16.msra.mxu0 %v2057_v4  ;;  %2097 = vmatpush3.bf16.msra.mxu1 %v2057_v4  ;;  %v2069_v14 = vpack.c.bf16 %v111_v13, %v110_v12  ;;  %v112_v15 = vld [vmem:[#allocation6 + $0x40] sm:$0xff]  ;;  %v298_v18 = vld [vmem:[%s3333_s2 + $0x8] sm:$0xff]  ;;  %v299_v20 = vld [vmem:[%s3333_s2 + $0x10] sm:$0xff]  ;;  %vm3342_vm0 = vcmp.lt.s32.totalorder %v2398_v56, 8  ;;  %vm433_vm1 = vcmp.ne.s32.totalorder %v2400_v57, %v2398_v56  ;;  %53 = vst.msk [vmem:[#allocation3 + $0x8] sm:$0xff] %vm3338_vm5, %v3336_v62 }
  0x17   :  { %2062 = vmatprep.subr.bf16.mxu0 %v2061_v6  ;;  %2090 = vmatprep.subr.bf16.mxu1 %v2061_v6  ;;  %v297_v17 = vld [vmem:[%s3333_s2] sm:$0xff]  ;;  %v2073_v19 = vpack.c.bf16 %v113_v16, %v112_v15  ;;  %v114_v21 = vld [vmem:[#allocation6 + $0x50] sm:$0xff]  ;;  %v115_v22 = vld [vmem:[#allocation6 + $0x58] sm:$0xff]  ;;  %54 = vst.msk [vmem:[#allocation3 + $0x10] sm:$0xff] %vm3338_vm5, %v3336_v62 }
  0x18   :  { %2033 = vmatprep.mubr.f32.mxu0 %v120_v10  ;;  %2045 = vmatprep.mubr.f32.mxu1 %v128_v11  ;;  %v300_v23 = vld [vmem:[%s3333_s2 + $0x18] sm:$0xff]  ;;  %v301_v24 = vld [vmem:[%s3333_s2 + $0x20] sm:$0xff]  ;;  %v2077_v25 = vpack.c.bf16 %v115_v22, %v114_v21  ;;  %v117_v27 = vld [vmem:[#allocation6 + $0x68] sm:$0xff]  ;;  %55 = vst.msk [vmem:[#allocation3 + $0x18] sm:$0xff] %vm3338_vm5, %v3336_v62 }
  0x19   :  { %315 = vperm.xlu0 %2111, %v297_v17   ;;  %321 = vperm.xlu1 %2112, %v299_v20   ;;  %v116_v26 = vld [vmem:[#allocation6 + $0x60] sm:$0xff]  ;;  %v302_v28 = vld [vmem:[%s3333_s2 + $0x28] sm:$0xff]  ;;  %v303_v29 = vld [vmem:[%s3333_s2 + $0x30] sm:$0xff]  ;;  %56 = vst.msk [vmem:[#allocation3 + $0x20] sm:$0xff] %vm3338_vm5, %v3336_v62 }
  0x1a   :  { %2064 = vmatpush3.bf16.msra.mxu0 %v2061_v6  ;;  %2098 = vmatpush3.bf16.msra.mxu1 %v2061_v6  ;;  %v2081_v30 = vpack.c.bf16 %v117_v27, %v116_v26  ;;  %v118_v31 = vld [vmem:[#allocation6 + $0x70] sm:$0xff]  ;;  %v119_v32 = vld [vmem:[#allocation6 + $0x78] sm:$0xff]  ;;  %v305_v34 = vld [vmem:[%s3333_s2 + $0x40] sm:$0xff]  ;;  %57 = vst.msk [vmem:[#allocation3 + $0x28] sm:$0xff] %vm3338_vm5, %v3336_v62 }
  0x1b   :  { %2066 = vmatprep.subr.bf16.mxu0 %v2065_v9  ;;  %2091 = vmatprep.subr.bf16.mxu1 %v2065_v9  ;;  %v304_v33 = vld [vmem:[%s3333_s2 + $0x38] sm:$0xff]  ;;  %v2085_v35 = vpack.c.bf16 %v119_v32, %v118_v31  ;;  %v306_v36 = vld [vmem:[%s3333_s2 + $0x48] sm:$0xff]  ;;  %v307_v37 = vld [vmem:[%s3333_s2 + $0x50] sm:$0xff]  ;;  %58 = vst.msk [vmem:[#allocation3 + $0x30] sm:$0xff] %vm3338_vm5, %v3336_v62 }
  0x1c   :  { %v309_v38 = vld [vmem:[%s3333_s2 + $0x60] sm:$0xff]  ;;  %v121_v39 = vld [vmem:[%s3331_s0 + $0x8] sm:$0xff]  ;;  %v122_v41 = vld [vmem:[%s3331_s0 + $0x10] sm:$0xff]  ;;  %59 = vst.msk [vmem:[#allocation3 + $0x38] sm:$0xff] %vm3338_vm5, %v3336_v62 }
  0x1d   :  { %318 = vperm.xlu0 %2111, %v298_v18   ;;  %324 = vperm.xlu1 %2112, %v300_v23   ;;  %v129_v40 = vld [vmem:[%s3331_s0 + $0x48] sm:$0xff]  ;;  %v130_v42 = vld [vmem:[%s3331_s0 + $0x50] sm:$0xff]  ;;  %v308_v43 = vld [vmem:[%s3333_s2 + $0x58] sm:$0xff]  ;;  %60 = vst.msk [vmem:[#allocation3 + $0x40] sm:$0xff] %vm3338_vm5, %v3336_v62 }
  0x1e   :  { %2068 = vmatpush3.bf16.msra.mxu0 %v2065_v9  ;;  %2099 = vmatpush3.bf16.msra.mxu1 %v2065_v9  ;;  %v123_v44 = vld [vmem:[%s3331_s0 + $0x18] sm:$0xff]  ;;  %v124_v46 = vld [vmem:[%s3331_s0 + $0x20] sm:$0xff]  ;;  %v311_v48 = vld [vmem:[%s3333_s2 + $0x70] sm:$0xff]  ;;  %61 = vst.msk [vmem:[#allocation3 + $0x48] sm:$0xff] %vm3338_vm5, %v3336_v62 }
  0x1f   :  { %2070 = vmatprep.subr.bf16.mxu0 %v2069_v14  ;;  %2092 = vmatprep.subr.bf16.mxu1 %v2069_v14  ;;  %v131_v45 = vld [vmem:[%s3331_s0 + $0x58] sm:$0xff]  ;;  %v132_v47 = vld [vmem:[%s3331_s0 + $0x60] sm:$0xff]  ;;  %v125_v49 = vld [vmem:[%s3331_s0 + $0x28] sm:$0xff]  ;;  %62 = vst.msk [vmem:[#allocation3 + $0x50] sm:$0xff] %vm3338_vm5, %v3336_v62 }
  0x20   :  { %v133_v50 = vld [vmem:[%s3331_s0 + $0x68] sm:$0xff]  ;;  %v126_v51 = vld [vmem:[%s3331_s0 + $0x30] sm:$0xff]  ;;  %v127_v53 = vld [vmem:[%s3331_s0 + $0x38] sm:$0xff]  ;;  %63 = vst.msk [vmem:[#allocation3 + $0x58] sm:$0xff] %vm3338_vm5, %v3336_v62 }
  0x21   :  { %327 = vperm.xlu0 %2111, %v301_v24   ;;  %330 = vperm.xlu1 %2112, %v302_v28   ;;  %v134_v52 = vld [vmem:[%s3331_s0 + $0x70] sm:$0xff]  ;;  %v135_v54 = vld [vmem:[%s3331_s0 + $0x78] sm:$0xff]  ;;  %v2408_v58 = vld [vmem:[%s3334_s3] ss:$0 sm:$0xff]  ;;  %64 = vst.msk [vmem:[#allocation3 + $0x60] sm:$0xff] %vm3338_vm5, %v3336_v62 }
  0x22   :  { %2072 = vmatpush3.bf16.msra.mxu0 %v2069_v14  ;;  %2100 = vmatpush3.bf16.msra.mxu1 %v2069_v14  ;;  %vm2412_vm2 = vmand %vm3342_vm0, %vm433_vm1  ;;  %65 = vst.msk [vmem:[#allocation3 + $0x68] sm:$0xff] %vm3338_vm5, %v3336_v62 }
  0x23   :  { %2074 = vmatprep.subr.bf16.mxu0 %v2073_v19  ;;  %2093 = vmatprep.subr.bf16.mxu1 %v2073_v19  ;;  %v3376_v59 = vsel %vm2412_vm2, 4294967295, %v3375_v59  ;;  %66 = vst.msk [vmem:[#allocation3 + $0x70] sm:$0xff] %vm3338_vm5, %v3336_v62  ;;  %67 = vst.msk [vmem:[#allocation3 + $0x78] sm:$0xff] %vm3338_vm5, %v3336_v62 }
  0x24   :  { %68 = vst.msk [vmem:[#allocation4] sm:$0xff] %vm3338_vm5, %v3336_v62  ;;  %69 = vst.msk [vmem:[#allocation4 + $0x8] sm:$0xff] %vm3338_vm5, %v3336_v62 }
  0x25   :  { %333 = vperm.xlu0 %2111, %v303_v29   ;;  %336 = vperm.xlu1 %2112, %v304_v33   ;;  %70 = vst.msk [vmem:[#allocation4 + $0x10] sm:$0xff] %vm3338_vm5, %v3336_v62  ;;  %71 = vst.msk [vmem:[#allocation4 + $0x18] sm:$0xff] %vm3338_vm5, %v3336_v62 }
  0x26   :  { %2076 = vmatpush3.bf16.msra.mxu0 %v2073_v19  ;;  %2101 = vmatpush3.bf16.msra.mxu1 %v2073_v19  ;;  %72 = vst.msk [vmem:[#allocation4 + $0x20] sm:$0xff] %vm3338_vm5, %v3336_v62  ;;  %73 = vst.msk [vmem:[#allocation4 + $0x28] sm:$0xff] %vm3338_vm5, %v3336_v62 }
  0x27   :  { %2078 = vmatprep.subr.bf16.mxu0 %v2077_v25  ;;  %2094 = vmatprep.subr.bf16.mxu1 %v2077_v25  ;;  %74 = vst.msk [vmem:[#allocation4 + $0x30] sm:$0xff] %vm3338_vm5, %v3336_v62  ;;  %75 = vst.msk [vmem:[#allocation4 + $0x38] sm:$0xff] %vm3338_vm5, %v3336_v62 }
  0x28   :  { %76 = vst.msk [vmem:[#allocation4 + $0x40] sm:$0xff] %vm3338_vm5, %v3336_v62  ;;  %77 = vst.msk [vmem:[#allocation4 + $0x48] sm:$0xff] %vm3338_vm5, %v3336_v62 }
  0x29   :  { %339 = vperm.xlu0 %2111, %v305_v34   ;;  %342 = vperm.xlu1 %2112, %v306_v36   ;;  %78 = vst.msk [vmem:[#allocation4 + $0x50] sm:$0xff] %vm3338_vm5, %v3336_v62  ;;  %79 = vst.msk [vmem:[#allocation4 + $0x58] sm:$0xff] %vm3338_vm5, %v3336_v62 }
  0x2a   :  { %2080 = vmatpush3.bf16.msra.mxu0 %v2077_v25  ;;  %2102 = vmatpush3.bf16.msra.mxu1 %v2077_v25  ;;  %80 = vst.msk [vmem:[#allocation4 + $0x60] sm:$0xff] %vm3338_vm5, %v3336_v62  ;;  %81 = vst.msk [vmem:[#allocation4 + $0x68] sm:$0xff] %vm3338_vm5, %v3336_v62 }
  0x2b   :  { %2082 = vmatprep.subr.bf16.mxu0 %v2081_v30  ;;  %2095 = vmatprep.subr.bf16.mxu1 %v2081_v30  ;;  %82 = vst.msk [vmem:[#allocation4 + $0x70] sm:$0xff] %vm3338_vm5, %v3336_v62  ;;  %83 = vst.msk [vmem:[#allocation4 + $0x78] sm:$0xff] %vm3338_vm5, %v3336_v62 }
  0x2c   :  { %85 = vst.msk [vmem:[#allocation5 + $0x8] sm:$0xff] %vm3338_vm5, %v3336_v62  ;;  %86 = vst.msk [vmem:[#allocation5 + $0x10] sm:$0xff] %vm3338_vm5, %v3336_v62 }
  0x2d   :  { %345 = vperm.xlu0 %2111, %v307_v37   ;;  %351 = vperm.xlu1 %2112, %v309_v38   ;;  %87 = vst.msk [vmem:[#allocation5 + $0x18] sm:$0xff] %vm3338_vm5, %v3336_v62  ;;  %88 = vst.msk [vmem:[#allocation5 + $0x20] sm:$0xff] %vm3338_vm5, %v3336_v62  ;;  %v396_v37 = vadd.s32 8, %v2400_v57 }
  0x2e   :  { %2084 = vmatpush3.bf16.msra.mxu0 %v2081_v30  ;;  %2103 = vmatpush3.bf16.msra.mxu1 %v2081_v30  ;;  %89 = vst.msk [vmem:[#allocation5 + $0x28] sm:$0xff] %vm3338_vm5, %v3336_v62  ;;  %90 = vst.msk [vmem:[#allocation5 + $0x30] sm:$0xff] %vm3338_vm5, %v3336_v62 }
  0x2f   :  { %2086 = vmatprep.subr.bf16.mxu0 %v2085_v35  ;;  %2096 = vmatprep.subr.bf16.mxu1 %v2085_v35  ;;  %91 = vst.msk [vmem:[#allocation5 + $0x38] sm:$0xff] %vm3338_vm5, %v3336_v62  ;;  %92 = vst.msk [vmem:[#allocation5 + $0x40] sm:$0xff] %vm3338_vm5, %v3336_v62  ;;  %vm434_vm6 = vcmp.ne.s32.totalorder %v396_v37, %v2398_v56 }
  0x30   :  { %93 = vst.msk [vmem:[#allocation5 + $0x48] sm:$0xff] %vm3338_vm5, %v3336_v62  ;;  %94 = vst.msk [vmem:[#allocation5 + $0x50] sm:$0xff] %vm3338_vm5, %v3336_v62 }
  0x31   :  { %348 = vperm.xlu0 %2111, %v308_v43   ;;  %95 = vst.msk [vmem:[#allocation5 + $0x58] sm:$0xff] %vm3338_vm5, %v3336_v62  ;;  %96 = vst.msk [vmem:[#allocation5 + $0x60] sm:$0xff] %vm3338_vm5, %v3336_v62 }
  0x32   :  { %2088 = vmatpush3.bf16.msra.mxu0 %v2085_v35  ;;  %2104 = vmatpush3.bf16.msra.mxu1 %v2085_v35  ;;  %97 = vst.msk [vmem:[#allocation5 + $0x68] sm:$0xff] %vm3338_vm5, %v3336_v62  ;;  %98 = vst.msk [vmem:[#allocation5 + $0x70] sm:$0xff] %vm3338_vm5, %v3336_v62 }
  0x33   :  { %99 = vst.msk [vmem:[#allocation5 + $0x78] sm:$0xff] %vm3338_vm5, %v3336_v62  ;;  %45 = vst.msk [vmem:[#allocation2 + $0x48] sm:$0xff] %vm3338_vm5, %v2270_v0 }
  0x34   :  { %36 = vst.msk [vmem:[#allocation2] sm:$0xff] %vm3338_vm5, %v2270_v0  ;;  %37 = vst.msk [vmem:[#allocation2 + $0x8] sm:$0xff] %vm3338_vm5, %v2270_v0 }
  0x35   :  { %2034 = vmatmul.mubr.f32.vlgmr.msra.gmra.mrb[0].mxu0 %v121_v39  ;;  %2046 = vmatmul.mubr.f32.vlgmr.msra.gmra.mrb[0].mxu1 %v129_v40  ;;  %38 = vst.msk [vmem:[#allocation2 + $0x10] sm:$0xff] %vm3338_vm5, %v2270_v0  ;;  %39 = vst.msk [vmem:[#allocation2 + $0x18] sm:$0xff] %vm3338_vm5, %v2270_v0 }
  0x36   :  { %2036 = vmatprep.mubr.f32.mxu0 %v122_v41  ;;  %2048 = vmatprep.mubr.f32.mxu1 %v130_v42  ;;  %40 = vst.msk [vmem:[#allocation2 + $0x20] sm:$0xff] %vm3338_vm5, %v2270_v0  ;;  %41 = vst.msk [vmem:[#allocation2 + $0x28] sm:$0xff] %vm3338_vm5, %v2270_v0 }
  0x37   :  { %357 = vperm.xlu0 %2111, %v311_v48   ;;  %42 = vst.msk [vmem:[#allocation2 + $0x30] sm:$0xff] %vm3338_vm5, %v2270_v0  ;;  %43 = vst.msk [vmem:[#allocation2 + $0x38] sm:$0xff] %vm3338_vm5, %v2270_v0 }
  0x38   :  { %44 = vst.msk [vmem:[#allocation2 + $0x40] sm:$0xff] %vm3338_vm5, %v2270_v0  ;;  %46 = vst.msk [vmem:[#allocation2 + $0x50] sm:$0xff] %vm3338_vm5, %v2270_v0 }
  0x39   :  { %2037 = vmatmul.mubr.f32.gmra.mrb[2].mxu0 %v123_v44  ;;  %2049 = vmatmul.mubr.f32.gmra.mrb[2].mxu1 %v131_v45  ;;  %47 = vst.msk [vmem:[#allocation2 + $0x58] sm:$0xff] %vm3338_vm5, %v2270_v0  ;;  %48 = vst.msk [vmem:[#allocation2 + $0x60] sm:$0xff] %vm3338_vm5, %v2270_v0 }
  0x3a   :  { %2039 = vmatprep.mubr.f32.mxu0 %v124_v46  ;;  %2051 = vmatprep.mubr.f32.mxu1 %v132_v47  ;;  %49 = vst.msk [vmem:[#allocation2 + $0x68] sm:$0xff] %vm3338_vm5, %v2270_v0  ;;  %50 = vst.msk [vmem:[#allocation2 + $0x70] sm:$0xff] %vm3338_vm5, %v2270_v0  ;;  %v3379_v47 = vmov 0 }
  0x3b   :  { %51 = vst.msk [vmem:[#allocation2 + $0x78] sm:$0xff] %vm3338_vm5, %v2270_v0  ;;  %vm2611_vm8 = vmand %vm3342_vm0, %vm434_vm6 }
  0x3c   :  { %v3380_v47 = vsel %vm2611_vm8, 4294967295, %v3379_v47 }
  0x3d   :  { %2040 = vmatmul.mubr.f32.gmra.mrb[4].mxu0 %v125_v49  ;;  %2052 = vmatmul.mubr.f32.gmra.mrb[4].mxu1 %v133_v50 }
  0x3e   :  { %2042 = vmatprep.mubr.f32.mxu0 %v126_v51  ;;  %2054 = vmatprep.mubr.f32.mxu1 %v134_v52 }
  0x41   :  { %2043 = vmatmul.mubr.f32.gmra.mrb[6].mxu0 %v127_v53  ;;  %2055 = vmatmul.mubr.f32.gmra.mrb[6].mxu1 %v135_v54 }
  0x98   :  { %v316_v60 = vpop.permute.xlu0 %315  ;;  %v2538_v1 = vpop.permute.xlu1 %321 }
  0x99   :  { %vm366_vm3 = vcmp.eq.s32.totalorder %v316_v60, %v2408_v58 }
  0x9a   :  { %vm2419_vm4 = vmand %vm366_vm3, %vm2412_vm2 }
  0x9b   :  { %v1937_v63 = vsel %vm2419_vm4, 1.0, %v3336_v62 }
  0x9c   :  { %1058 = vadd.xlane.f32.xlu1 %v1937_v63  ;;  %v2564_v20 = vpop.permute.xlu1 %324  ;;  %v319_v43 = vpop.permute.xlu0 %318 }
  0x9d   :  { %vm367_vm7 = vcmp.eq.s32.totalorder %v319_v43, %v2408_v58  ;;  %v468_v43 = vld [vmem:[#allocation2 + $0x18] sm:$0xff]  ;;  %vm369_vm11 = vcmp.eq.s32.totalorder %v2564_v20, %v2408_v58  ;;  %v399_v20 = vadd.s32 32, %v2400_v57 }
  0x9e   :  { %vm2619_vm9 = vmand %vm367_vm7, %vm2611_vm8 }
  0x9f   :  { %v1938_v53 = vsel %vm2619_vm9, 1.0, %v3336_v62  ;;  %v2713_v62 = vld [vmem:[#allocation2 + $0x30] sm:$0xff] }
  0xa0   :  { %v2587_v38 = vpop.permute.xlu1 %330  ;;  %3393 = vst [vmem:[#allocation19_spill] sm:$0xff] %v2713_v62 }
  0xa1   :  { %vm371_vm15 = vcmp.eq.s32.totalorder %v2587_v38, %v2408_v58  ;;  %v3406_v38 = vmov 0 }
  0xa4   :  { %v2615_v48 = vpop.permute.xlu1 %336 }
  0xa8   :  { %v2633_v54 = vpop.permute.xlu1 %342 }
  0xa9   :  { %vm375_vm8 = vcmp.eq.s32.totalorder %v2633_v54, %v2408_v58 }
  0xac   :  { %v2643_v0 = vpop.permute.xlu1 %351 }
 0x108   :  { %v2035_v2 = vpop.f32.mrb[0].mxu0  ;;  %v2047_v3 = vpop.f32.mrb[0].mxu1 }
 0x109   :  { %v2540_v4 = vmul.f32 14.285714, %v2035_v2  ;;  %v2542_v5 = vmul.f32 14.285714, %v2047_v3  ;;  %v242_v6 = vpop.f32.mrb[1].mxu1  ;;  %v202_v7 = vpop.f32.mrb[1].mxu0 }
 0x10a   :  { %v2544_v8 = vmul.f32 14.285714, %v202_v7  ;;  %v2546_v9 = vmul.f32 14.285714, %v242_v6  ;;  %v2648_v3 = vld [vmem:[#allocation5] sm:$0xff] }
 0x10b   :  { %v490_v10 = vsel %vm3342_vm0, %v2542_v5, -1e+30  ;;  %v482_v11 = vsel %vm3342_vm0, %v2540_v4, -1e+30 }
 0x10c   :  { %515 = vmax.xlane.f32.xlu1 %v490_v10  ;;  %499 = vmax.xlane.f32.xlu0 %v482_v11  ;;  %v2038_v12 = vpop.f32.mrb[2].mxu0  ;;  %v2050_v13 = vpop.f32.mrb[2].mxu1  ;;  %v481_v15 = vsel %vm3342_vm0, %v2544_v8, -1e+30  ;;  %v489_v19 = vsel %vm3342_vm0, %v2546_v9, -1e+30 }
 0x10d   :  { %v2554_v14 = vmul.f32 14.285714, %v2038_v12  ;;  %v212_v16 = vpop.f32.mrb[3].mxu0  ;;  %v252_v17 = vpop.f32.mrb[3].mxu1  ;;  %v2566_v21 = vmul.f32 14.285714, %v2050_v13 }
 0x10e   :  { %v2559_v18 = vmul.f32 14.285714, %v212_v16  ;;  %v2568_v22 = vmul.f32 14.285714, %v252_v17  ;;  %v310_v10 = vld [vmem:[%s3333_s2 + $0x68] sm:$0xff]  ;;  %v312_v11 = vld [vmem:[%s3333_s2 + $0x78] sm:$0xff]  ;;  %v2658_v12 = vpop.permute.xlu0 %327 }
 0x10f   :  { %v484_v25 = vsel %vm3342_vm0, %v2554_v14, -1e+30  ;;  %v492_v29 = vsel %vm3342_vm0, %v2566_v21, -1e+30  ;;  %vm370_vm2 = vcmp.eq.s32.totalorder %v2658_v12, %v2408_v58 }
 0x110   :  { %513 = vmax.xlane.f32.xlu0 %v489_v19  ;;  %497 = vmax.xlane.f32.xlu1 %v481_v15  ;;  %v2041_v23 = vpop.f32.mrb[4].mxu0  ;;  %v2053_v24 = vpop.f32.mrb[4].mxu1  ;;  %v483_v26 = vsel %vm3342_vm0, %v2559_v18, -1e+30  ;;  %v491_v30 = vsel %vm3342_vm0, %v2568_v22, -1e+30 }
 0x111   :  { %v222_v27 = vpop.f32.mrb[5].mxu0  ;;  %v262_v28 = vpop.f32.mrb[5].mxu1  ;;  %v2582_v33 = vmul.f32 14.285714, %v2041_v23  ;;  %v2589_v39 = vmul.f32 14.285714, %v2053_v24 }
 0x112   :  { %v2584_v34 = vmul.f32 14.285714, %v222_v27  ;;  %v2591_v40 = vmul.f32 14.285714, %v262_v28  ;;  %v2660_v13 = vpop.permute.xlu0 %333  ;;  %v474_v23 = vld [vmem:[#allocation2 + $0x48] sm:$0xff] }
 0x113   :  { %v486_v41 = vsel %vm3342_vm0, %v2582_v33, -1e+30  ;;  %v494_v44 = vsel %vm3342_vm0, %v2589_v39, -1e+30  ;;  %v466_v24 = vld [vmem:[#allocation2 + $0x8] sm:$0xff] }
 0x114   :  { %503 = vmax.xlane.f32.xlu1 %v484_v25  ;;  %501 = vmax.xlane.f32.xlu0 %v483_v26  ;;  %v2044_v31 = vpop.f32.mrb[6].mxu0  ;;  %v2056_v32 = vpop.f32.mrb[6].mxu1  ;;  %v485_v42 = vsel %vm3342_vm0, %v2584_v34, -1e+30  ;;  %v493_v45 = vsel %vm3342_vm0, %v2591_v40, -1e+30 }
 0x115   :  { %v232_v35 = vpop.f32.mrb[7].mxu0  ;;  %v272_v36 = vpop.f32.mrb[7].mxu1  ;;  %v2607_v46 = vmul.f32 14.285714, %v2044_v31  ;;  %v2623_v50 = vmul.f32 14.285714, %v2056_v32 }
 0x116   :  { %v2628_v52 = vmul.f32 14.285714, %v232_v35  ;;  %v2638_v60 = vmul.f32 14.285714, %v272_v36  ;;  %v2662_v15 = vpop.permute.xlu0 %339  ;;  %v2676_v35 = vld [vmem:[#allocation5 + $0x8] sm:$0xff] }
 0x117   :  { %v488_v51 = vsel %vm3342_vm0, %v2607_v46, -1e+30  ;;  %v496_v55 = vsel %vm3342_vm0, %v2623_v50, -1e+30 }
 0x118   :  { %519 = vmax.xlane.f32.xlu1 %v492_v29  ;;  %517 = vmax.xlane.f32.xlu0 %v491_v30  ;;  %v487_v63 = vsel %vm3342_vm0, %v2628_v52, -1e+30  ;;  %v495_v2 = vsel %vm3342_vm0, %v2638_v60, -1e+30  ;;  %v473_v29 = vld [vmem:[#allocation2 + $0x40] sm:$0xff] }
 0x119   :  { %v465_v30 = vld [vmem:[#allocation2] sm:$0xff] }
 0x11a   :  { %v2664_v16 = vpop.permute.xlu0 %345 }
 0x11c   :  { %507 = vmax.xlane.f32.xlu1 %v486_v41  ;;  %505 = vmax.xlane.f32.xlu0 %v485_v42 }
 0x11e   :  { %v2666_v17 = vpop.permute.xlu0 %348 }
 0x120   :  { %523 = vmax.xlane.f32.xlu1 %v494_v44  ;;  %521 = vmax.xlane.f32.xlu0 %v493_v45  ;;  %v467_v44 = vld [vmem:[#allocation2 + $0x10] sm:$0xff] }
 0x122   :  { %v2668_v19 = vpop.permute.xlu0 %357 }
 0x124   :  { %1060 = vadd.xlane.f32.xlu0 %v1938_v53  ;;  %511 = vmax.xlane.f32.xlu1 %v488_v51 }
 0x128   :  { %527 = vmax.xlane.f32.xlu1 %v496_v55  ;;  %509 = vmax.xlane.f32.xlu0 %v487_v63 }
 0x129   :  { %v1059_v6 = vpop.xlane.xlu1 %1058 }
 0x12a   :  { %v1090_v7 = vadd.f32 %v1059_v6, %v2648_v3 }
 0x12c   :  { %525 = vmax.xlane.f32.xlu0 %v495_v2  ;;  %1106 = vst.msk [vmem:[#allocation5] sm:$0xff] %vm3338_vm5, %v1090_v7  ;;  %v476_v7 = vld [vmem:[#allocation2 + $0x58] sm:$0xff] }
 0x139   :  { %354 = vperm.xlu1 %2112, %v310_v10   ;;  %v475_v10 = vld [vmem:[#allocation2 + $0x50] sm:$0xff] }
 0x13d   :  { %360 = vperm.xlu1 %2112, %v312_v11  }
 0x199   :  { %v516_v25 = vpop.xlane.xlu1 %515  ;;  %v500_v26 = vpop.xlane.xlu0 %499 }
 0x19a   :  { %v538_v27 = vmax.f32 %v474_v23, %v516_v25  ;;  %v530_v28 = vmax.f32 %v466_v24, %v500_v26 }
 0x19c   :  { %v2670_v31 = vsub.f32 %v474_v23, %v538_v27  ;;  %843 = vst.msk [vmem:[#allocation2 + $0x48] sm:$0xff] %vm3338_vm5, %v538_v27  ;;  %v2673_v32 = vsub.f32 %v466_v24, %v530_v28  ;;  %835 = vst.msk [vmem:[#allocation2 + $0x8] sm:$0xff] %vm3338_vm5, %v530_v28  ;;  %600 = vperm.xlu1 %2112, %v530_v28   ;;  %v470_v28 = vld [vmem:[#allocation2 + $0x28] sm:$0xff] }
 0x19d   :  { %v514_v36 = vpop.xlane.xlu0 %513  ;;  %v498_v37 = vpop.xlane.xlu1 %497 }
 0x19e   :  { %3383 = vst [vmem:[#allocation9_spill] sm:$0xff] %v2673_v32  ;;  %v537_v41 = vmax.f32 %v473_v29, %v514_v36  ;;  %v529_v42 = vmax.f32 %v465_v30, %v498_v37  ;;  %v2680_v45 = vmul.f32 %v2676_v35, %v2673_v32 }
 0x1a0   :  { %v2682_v51 = vsub.f32 %v473_v29, %v537_v41  ;;  %842 = vst.msk [vmem:[#allocation2 + $0x40] sm:$0xff] %vm3338_vm5, %v537_v41  ;;  %v2685_v53 = vsub.f32 %v465_v30, %v529_v42  ;;  %834 = vst.msk [vmem:[#allocation2] sm:$0xff] %vm3338_vm5, %v529_v42  ;;  %640 = vperm.xlu1 %2112, %v538_v27   ;;  %595 = vperm.xlu0 %2111, %v529_v42   ;;  %v469_v29 = vld [vmem:[#allocation2 + $0x20] sm:$0xff] }
 0x1a1   :  { %v504_v55 = vpop.xlane.xlu1 %503  ;;  %v502_v63 = vpop.xlane.xlu0 %501 }
 0x1a2   :  { %3384 = vst [vmem:[#allocation10_spill] sm:$0xff] %v2682_v51  ;;  %v532_v2 = vmax.f32 %v468_v43, %v504_v55  ;;  %v531_v6 = vmax.f32 %v467_v44, %v502_v63  ;;  %v477_v55 = vld [vmem:[#allocation2 + $0x60] sm:$0xff] }
 0x1a4   :  { %v2688_v11 = vsub.f32 %v468_v43, %v532_v2  ;;  %837 = vst.msk [vmem:[#allocation2 + $0x18] sm:$0xff] %vm3338_vm5, %v532_v2  ;;  %v2691_v23 = vsub.f32 %v467_v44, %v531_v6  ;;  %836 = vst.msk [vmem:[#allocation2 + $0x10] sm:$0xff] %vm3338_vm5, %v531_v6  ;;  %610 = vperm.xlu1 %2112, %v532_v2   ;;  %635 = vperm.xlu0 %2111, %v537_v41   ;;  %v478_v44 = vld [vmem:[#allocation2 + $0x68] sm:$0xff] }
 0x1a5   :  { %v520_v24 = vpop.xlane.xlu1 %519  ;;  %v518_v25 = vpop.xlane.xlu0 %517 }
 0x1a6   :  { %3385 = vst [vmem:[#allocation11_spill] sm:$0xff] %v2688_v11  ;;  %3386 = vst [vmem:[#allocation12_spill] sm:$0xff] %v2691_v23  ;;  %v540_v26 = vmax.f32 %v476_v7, %v520_v24  ;;  %v539_v27 = vmax.f32 %v475_v10, %v518_v25  ;;  %v472_v25 = vld [vmem:[#allocation2 + $0x38] sm:$0xff] }
 0x1a8   :  { %v2694_v30 = vsub.f32 %v476_v7, %v540_v26  ;;  %845 = vst.msk [vmem:[#allocation2 + $0x58] sm:$0xff] %vm3338_vm5, %v540_v26  ;;  %v2697_v36 = vsub.f32 %v475_v10, %v539_v27  ;;  %844 = vst.msk [vmem:[#allocation2 + $0x50] sm:$0xff] %vm3338_vm5, %v539_v27  ;;  %650 = vperm.xlu1 %2112, %v540_v26   ;;  %605 = vperm.xlu0 %2111, %v531_v6  }
 0x1a9   :  { %v508_v37 = vpop.xlane.xlu1 %507  ;;  %v506_v42 = vpop.xlane.xlu0 %505 }
 0x1aa   :  { %3387 = vst [vmem:[#allocation13_spill] sm:$0xff] %v2694_v30  ;;  %3388 = vst [vmem:[#allocation14_spill] sm:$0xff] %v2697_v36  ;;  %v534_v43 = vmax.f32 %v470_v28, %v508_v37  ;;  %v533_v41 = vmax.f32 %v469_v29, %v506_v42  ;;  %v3441_v36 = vmov 0 }
 0x1ac   :  { %v2700_v63 = vsub.f32 %v470_v28, %v534_v43  ;;  %839 = vst.msk [vmem:[#allocation2 + $0x28] sm:$0xff] %vm3338_vm5, %v534_v43  ;;  %v2703_v2 = vsub.f32 %v469_v29, %v533_v41  ;;  %838 = vst.msk [vmem:[#allocation2 + $0x20] sm:$0xff] %vm3338_vm5, %v533_v41  ;;  %620 = vperm.xlu1 %2112, %v534_v43   ;;  %645 = vperm.xlu0 %2111, %v539_v27   ;;  %v480_v43 = vld [vmem:[#allocation2 + $0x78] sm:$0xff] }
 0x1ad   :  { %v524_v7 = vpop.xlane.xlu1 %523  ;;  %v522_v10 = vpop.xlane.xlu0 %521 }
 0x1ae   :  { %3389 = vst [vmem:[#allocation15_spill] sm:$0xff] %v2700_v63  ;;  %3390 = vst [vmem:[#allocation16_spill] sm:$0xff] %v2703_v2  ;;  %v542_v24 = vmax.f32 %v478_v44, %v524_v7  ;;  %v541_v6 = vmax.f32 %v477_v55, %v522_v10 }
 0x1b0   :  { %v2706_v26 = vsub.f32 %v478_v44, %v542_v24  ;;  %847 = vst.msk [vmem:[#allocation2 + $0x68] sm:$0xff] %vm3338_vm5, %v542_v24  ;;  %v2709_v37 = vsub.f32 %v477_v55, %v541_v6  ;;  %846 = vst.msk [vmem:[#allocation2 + $0x60] sm:$0xff] %vm3338_vm5, %v541_v6  ;;  %660 = vperm.xlu1 %2112, %v542_v24   ;;  %615 = vperm.xlu0 %2111, %v533_v41   ;;  %v2722_v24 = vld [vmem:[#allocation2 + $0x70] sm:$0xff] }
 0x1b1   :  { %v1061_v28 = vpop.xlane.xlu0 %1060  ;;  %v512_v29 = vpop.xlane.xlu1 %511  ;;  %3396 = vst [vmem:[#allocation22_spill] sm:$0xff] %v2722_v24 }
 0x1b2   :  { %3391 = vst [vmem:[#allocation17_spill] sm:$0xff] %v2706_v26  ;;  %3392 = vst [vmem:[#allocation18_spill] sm:$0xff] %v2709_v37  ;;  %v1091_v42 = vadd.f32 %v1061_v28, %v2676_v35  ;;  %v536_v27 = vmax.f32 %v472_v25, %v512_v29  ;;  %v398_v28 = vadd.s32 24, %v2400_v57  ;;  %v400_v29 = vadd.s32 40, %v2400_v57 }
 0x1b3   :  { %v3436_v37 = vmov 0 }
 0x1b4   :  { %v2715_v7 = vsub.f32 %v472_v25, %v536_v27  ;;  %841 = vst.msk [vmem:[#allocation2 + $0x38] sm:$0xff] %vm3338_vm5, %v536_v27  ;;  %630 = vperm.xlu1 %2112, %v536_v27   ;;  %655 = vperm.xlu0 %2111, %v541_v6   ;;  %1107 = vst.msk [vmem:[#allocation5 + $0x8] sm:$0xff] %vm3338_vm5, %v1091_v42  ;;  %vm436_vm10 = vcmp.ne.s32.totalorder %v398_v28, %v2398_v56  ;;  %v3399_v42 = vmov 0  ;;  %v402_v27 = vadd.s32 56, %v2400_v57 }
 0x1b5   :  { %v528_v44 = vpop.xlane.xlu1 %527  ;;  %v510_v55 = vpop.xlane.xlu0 %509  ;;  %vm2741_vm12 = vmand %vm3342_vm0, %vm436_vm10  ;;  %vm438_vm13 = vcmp.ne.s32.totalorder %v400_v29, %v2398_v56  ;;  %vm437_vm10 = vcmp.ne.s32.totalorder %v399_v20, %v2398_v56  ;;  %v406_v29 = vadd.s32 88, %v2400_v57  ;;  %v3410_v20 = vmov 0 }
 0x1b6   :  { %3394 = vst [vmem:[#allocation20_spill] sm:$0xff] %v2715_v7  ;;  %v544_v10 = vmax.f32 %v480_v43, %v528_v44  ;;  %v2720_v41 = vmax.f32 %v2713_v62, %v510_v55  ;;  %v3400_v42 = vsel %vm2741_vm12, 4294967295, %v3399_v42  ;;  %vm2750_vm14 = vmand %vm369_vm11, %vm2741_vm12  ;;  %v3401_v44 = vmov 0 }
 0x1b7   :  { %v3402_v44 = vsel %vm2750_vm14, 4294967295, %v3401_v44  ;;  %vm2759_vm1 = vmand %vm3342_vm0, %vm438_vm13  ;;  %v3403_v55 = vmov 0  ;;  %vm440_vm3 = vcmp.ne.s32.totalorder %v402_v27, %v2398_v56  ;;  %vm373_vm11 = vcmp.eq.s32.totalorder %v2615_v48, %v2408_v58 }
 0x1b8   :  { %3395 = vst [vmem:[#allocation21_spill] sm:$0xff] %v2720_v41  ;;  %v2724_v35 = vsub.f32 %v480_v43, %v544_v10  ;;  %849 = vst.msk [vmem:[#allocation2 + $0x78] sm:$0xff] %vm3338_vm5, %v544_v10  ;;  %670 = vperm.xlu1 %2112, %v544_v10   ;;  %v397_v43 = vadd.s32 16, %v2400_v57  ;;  %v3404_v55 = vsel %vm2759_vm1, 4294967295, %v3403_v55  ;;  %v404_v10 = vadd.s32 72, %v2400_v57 }
 0x1b9   :  { %840 = vst.msk [vmem:[#allocation2 + $0x30] sm:$0xff] %vm3338_vm5, %v2720_v41  ;;  %v526_v25 = vpop.xlane.xlu0 %525  ;;  %vm2771_vm7 = vmand %vm371_vm15, %vm2759_vm1  ;;  %v3408_v27 = vmov 0  ;;  %vm368_vm15 = vcmp.eq.s32.totalorder %v2538_v1, %v2408_v58  ;;  %v3412_v48 = vmov 0  ;;  %v3414_v1 = vmov 0  ;;  %v355_v12 = vpop.permute.xlu1 %354 }
 0x1ba   :  { %3397 = vst [vmem:[#allocation23_spill] sm:$0xff] %v2724_v35  ;;  %v2730_v6 = vmax.f32 %v2722_v24, %v526_v25  ;;  %vm435_vm6 = vcmp.ne.s32.totalorder %v397_v43, %v2398_v56  ;;  %v3405_v25 = vmov 0.0   ;;  %v3407_v38 = vsel %vm2771_vm7, 4294967295, %v3406_v38  ;;  %vm2781_vm13 = vmand %vm3342_vm0, %vm440_vm3 }
 0x1bb   :  { %v1940_v28 = vsel %vm2750_vm14, 1.0, %v3405_v25  ;;  %v3409_v27 = vsel %vm2781_vm13, 4294967295, %v3408_v27  ;;  %v401_v43 = vadd.s32 48, %v2400_v57  ;;  %vm442_vm1 = vcmp.ne.s32.totalorder %v404_v10, %v2398_v56  ;;  %vm2797_vm12 = vmand %vm3342_vm0, %vm437_vm10 }
 0x1bc   :  { %3398 = vst [vmem:[#allocation24_spill] sm:$0xff] %v2730_v6  ;;  %848 = vst.msk [vmem:[#allocation2 + $0x70] sm:$0xff] %vm3338_vm5, %v2730_v6  ;;  %v3413_v48 = vsel %vm2797_vm12, 4294967295, %v3412_v48  ;;  %v403_v10 = vadd.s32 64, %v2400_v57  ;;  %v3416_v24 = vmov 0  ;;  %v3427_v7 = vmov 0 }
 0x1bd   :  { %vm2790_vm5 = vmand %vm3342_vm0, %vm435_vm6  ;;  %vm444_vm6 = vcmp.ne.s32.totalorder %v406_v29, %v2398_v56  ;;  %vm439_vm0 = vcmp.ne.s32.totalorder %v401_v43, %v2398_v56  ;;  %v3422_v29 = vmov 0  ;;  %v408_v43 = vadd.s32 104, %v2400_v57 }
 0x1be   :  { %v3411_v20 = vsel %vm2790_vm5, 4294967295, %v3410_v20  ;;  %vm2806_vm3 = vmand %vm373_vm11, %vm2781_vm13  ;;  %vm3418_vm11 = vcmp.lt.s32.totalorder %v2398_v56, 8 }
 0x1bf   :  { %v3415_v1 = vsel %vm2806_vm3, 4294967295, %v3414_v1  ;;  %vm2814_vm10 = vmand %vm368_vm15, %vm2790_vm5  ;;  %v1944_v54 = vsel %vm2806_vm3, 1.0, %v3405_v25  ;;  %vm441_vm5 = vcmp.ne.s32.totalorder %v403_v10, %v2398_v56  ;;  %vm446_vm3 = vcmp.ne.s32.totalorder %v408_v43, %v2398_v56 }
 0x1c0   :  { %v3417_v24 = vsel %vm2814_vm10, 4294967295, %v3416_v24  ;;  %vm2823_vm13 = vmand %vm3418_vm11, %vm442_vm1  ;;  %v1939_v35 = vsel %vm2814_vm10, 1.0, %v3405_v25  ;;  %vm3431_vm10 = vcmp.lt.s32.totalorder %v2398_v56, 8  ;;  %v3432_v10 = vmov 0 }
 0x1c1   :  { %vm2868_vm14 = vmand %vm3431_vm10, %vm441_vm5  ;;  %v405_v43 = vadd.s32 80, %v2400_v57  ;;  %vm374_vm5 = vcmp.eq.s32.totalorder %v2662_v15, %v2408_v58  ;;  %vm379_vm10 = vcmp.eq.s32.totalorder %v355_v12, %v2408_v58  ;;  %v361_v15 = vpop.permute.xlu1 %360 }
 0x1c2   :  { %v3433_v10 = vsel %vm2868_vm14, 4294967295, %v3432_v10 }
 0x1d3   :  { %1064 = vadd.xlane.f32.xlu0 %v1940_v28  ;;  %v1942_v28 = vsel %vm2771_vm7, 1.0, %v3405_v25  ;;  %vm3421_vm7 = vmmov %vm3418_vm11 }
 0x1d4   :  { %vm2831_vm15 = vmand %vm3421_vm7, %vm444_vm6 }
 0x1d5   :  { %v3423_v29 = vsel %vm2831_vm15, 4294967295, %v3422_v29  ;;  %vm3424_vm1 = vmmov %vm3421_vm7  ;;  %vm372_vm7 = vcmp.eq.s32.totalorder %v2660_v13, %v2408_v58 }
 0x1d6   :  { %vm2841_vm11 = vmand %vm3424_vm1, %vm439_vm0  ;;  %vm377_vm0 = vcmp.eq.s32.totalorder %v2666_v17, %v2408_v58 }
 0x1d7   :  { %1068 = vadd.xlane.f32.xlu0 %v1942_v28  ;;  %v3425_v28 = vmov 0  ;;  %vm2853_vm6 = vmand %vm375_vm8, %vm2823_vm13 }
 0x1d8   :  { %v3426_v28 = vsel %vm2841_vm11, 4294967295, %v3425_v28  ;;  %v3428_v7 = vsel %vm2853_vm6, 4294967295, %v3427_v7  ;;  %vm2861_vm1 = vmand %vm370_vm2, %vm2797_vm12  ;;  %v1946_v17 = vsel %vm2853_vm6, 1.0, %v3405_v25  ;;  %vm443_vm12 = vcmp.ne.s32.totalorder %v405_v43, %v2398_v56 }
 0x1d9   :  { %vm2878_vm2 = vmand %vm372_vm7, %vm2841_vm11  ;;  %v1941_v26 = vsel %vm2861_vm1, 1.0, %v3405_v25  ;;  %vm3438_vm7 = vcmp.lt.s32.totalorder %v2398_v56, 8 }
 0x1da   :  { %vm2890_vm8 = vmand %vm377_vm0, %vm2831_vm15  ;;  %v1943_v12 = vsel %vm2878_vm2, 1.0, %v3405_v25  ;;  %vm376_vm15 = vcmp.eq.s32.totalorder %v2664_v16, %v2408_v58 }
 0x1db   :  { %1072 = vadd.xlane.f32.xlu0 %v1944_v54  ;;  %v410_v54 = vadd.s32 120, %v2400_v57  ;;  %v3437_v37 = vsel %vm2890_vm8, 4294967295, %v3436_v37  ;;  %vm2897_vm11 = vmand %vm3438_vm7, %vm446_vm3 }
 0x1dc   :  { %1062 = vadd.xlane.f32.xlu1 %v1939_v35  ;;  %v3434_v35 = vmov 0  ;;  %vm2907_vm0 = vmand %vm374_vm5, %vm2868_vm14  ;;  %vm381_vm5 = vcmp.eq.s32.totalorder %v361_v15, %v2408_v58 }
 0x1dd   :  { %v3435_v35 = vsel %vm2878_vm2, 4294967295, %v3434_v35  ;;  %vm448_vm6 = vcmp.ne.s32.totalorder %v410_v54, %v2398_v56  ;;  %v3442_v36 = vsel %vm2907_vm0, 4294967295, %v3441_v36  ;;  %vm2918_vm3 = vmand %vm379_vm10, %vm2897_vm11  ;;  %v3443_v54 = vmov 0 }
 0x1de   :  { %v3444_v54 = vsel %vm2918_vm3, 4294967295, %v3443_v54  ;;  %vm3447_vm2 = vmmov %vm3438_vm7  ;;  %v1950_v15 = vsel %vm2918_vm3, 1.0, %v3405_v25  ;;  %v1945_v30 = vsel %vm2907_vm0, 1.0, %v3405_v25 }
 0x1df   :  { %1076 = vadd.xlane.f32.xlu0 %v1946_v17  ;;  %v1948_v17 = vsel %vm2890_vm8, 1.0, %v3405_v25  ;;  %vm2925_vm8 = vmand %vm3438_vm7, %vm448_vm6 }
 0x1e0   :  { %1066 = vadd.xlane.f32.xlu1 %v1941_v26  ;;  %v407_v26 = vadd.s32 96, %v2400_v57  ;;  %vm2933_vm14 = vmand %vm3447_vm2, %vm443_vm12  ;;  %vm378_vm2 = vcmp.eq.s32.totalorder %v2643_v0, %v2408_v58 }
 0x1e1   :  { %vm2947_vm6 = vmand %vm381_vm5, %vm2925_vm8 }
 0x1e2   :  { %vm445_vm10 = vcmp.ne.s32.totalorder %v407_v26, %v2398_v56  ;;  %vm2953_vm12 = vmand %vm376_vm15, %vm2933_vm14  ;;  %v1952_v26 = vsel %vm2947_vm6, 1.0, %v3405_v25 }
 0x1e3   :  { %1080 = vadd.xlane.f32.xlu0 %v1948_v17  ;;  %vm2961_vm3 = vmand %vm3438_vm7, %vm445_vm10  ;;  %vm380_vm10 = vcmp.eq.s32.totalorder %v2668_v19, %v2408_v58 }
 0x1e4   :  { %1070 = vadd.xlane.f32.xlu1 %v1943_v12  ;;  %v409_v12 = vadd.s32 112, %v2400_v57  ;;  %vm2974_vm15 = vmand %vm378_vm2, %vm2961_vm3 }
 0x1e6   :  { %vm447_vm5 = vcmp.ne.s32.totalorder %v409_v12, %v2398_v56  ;;  %v1949_v12 = vsel %vm2974_vm15, 1.0, %v3405_v25 }
 0x1e7   :  { %1084 = vadd.xlane.f32.xlu0 %v1950_v15  ;;  %vm2982_vm0 = vmand %vm3438_vm7, %vm447_vm5  ;;  %vm3462_vm5 = vnez %v3402_v44  ;;  %vm3468_vm7 = vnez %v3433_v10 }
 0x1e8   :  { %1074 = vadd.xlane.f32.xlu1 %v1945_v30  ;;  %v1947_v30 = vsel %vm2953_vm12, 1.0, %v3405_v25  ;;  %vm2991_vm2 = vmand %vm380_vm10, %vm2982_vm0  ;;  %vm3467_vm10 = vnez %v3400_v42 }
 0x1e9   :  { %v1951_v58 = vsel %vm2991_vm2, 1.0, %v3405_v25 }
 0x1eb   :  { %1088 = vadd.xlane.f32.xlu0 %v1952_v26 }
 0x1ec   :  { %1078 = vadd.xlane.f32.xlu1 %v1947_v30 }
 0x1f0   :  { %1082 = vadd.xlane.f32.xlu1 %v1949_v12 }
 0x1f4   :  { %1086 = vadd.xlane.f32.xlu1 %v1951_v58 }
 0x201   :  { %625 = vperm.xlu0 %2111, %v2720_v41  }
 0x205   :  { %665 = vperm.xlu0 %2111, %v2730_v6  }
 0x21b   :  { %v601_v56 = vpop.permute.xlu1 %600 }
 0x21c   :  { %v674_v19 = vsub.f32 %v2540_v4, %v601_v56 }
 0x21e   :  { %v931_v6 = vsel %vm2619_vm9, %v674_v19, 0.0  ;;  %v691_v11 = vmul.f32 1.442695, %v674_v19  ;;  %vm3464_vm9 = vnez %v3407_v38 }
 0x21f   :  { %v641_v30 = vpop.permute.xlu1 %640  ;;  %v596_v12 = vpop.permute.xlu0 %595 }
 0x220   :  { %v3002_v51 = vsub.f32 %v2542_v5, %v641_v30  ;;  %v673_v23 = vsub.f32 %v2544_v8, %v596_v12 }
 0x222   :  { %v707_v32 = vmul.f32 1.442695, %v3002_v51  ;;  %v930_v25 = vsel %vm2419_vm4, %v673_v23, 0.0  ;;  %v689_v5 = vmul.f32 1.442695, %v673_v23  ;;  %vm3463_vm4 = vnez %v3417_v24 }
 0x223   :  { %v611_v58 = vpop.permute.xlu1 %610  ;;  %946 = vadd.xlane.f32.xlu1 %v930_v25  ;;  %v636_v41 = vpop.permute.xlu0 %635 }
 0x224   :  { %v676_v4 = vsub.f32 %v2554_v14, %v611_v58  ;;  %948 = vadd.xlane.f32.xlu0 %v931_v6  ;;  %2113 = vpow2.f32 %v707_v32  ;;  %v3012_v56 = vsub.f32 %v2546_v9, %v636_v41 }
 0x225   :  { %2115 = vpow2.f32 %v691_v11 }
 0x226   :  { %v933_v8 = vsel %vm3462_vm5, %v676_v4, 0.0  ;;  %v695_v12 = vmul.f32 1.442695, %v676_v4  ;;  %2117 = vpow2.f32 %v689_v5  ;;  %v705_v14 = vmul.f32 1.442695, %v3012_v56 }
 0x227   :  { %v651_v61 = vpop.permute.xlu1 %650  ;;  %v606_v30 = vpop.permute.xlu0 %605  ;;  %vm3469_vm5 = vnez %v3423_v29 }
 0x228   :  { %v3017_v25 = vsub.f32 %v2566_v21, %v651_v61  ;;  %v675_v49 = vsub.f32 %v2559_v18, %v606_v30  ;;  %952 = vadd.xlane.f32.xlu0 %v933_v8  ;;  %2119 = vpow2.f32 %v695_v12 }
 0x229   :  { %2121 = vpow2.f32 %v705_v14 }
 0x22a   :  { %v932_v9 = vsel %vm3463_vm4, %v675_v49, 0.0  ;;  %v711_v41 = vmul.f32 1.442695, %v3017_v25  ;;  %v693_v58 = vmul.f32 1.442695, %v675_v49  ;;  %vm3470_vm4 = vnez %v3411_v20 }
 0x22b   :  { %v621_v32 = vpop.permute.xlu1 %620  ;;  %950 = vadd.xlane.f32.xlu1 %v932_v9  ;;  %v646_v23 = vpop.permute.xlu0 %645 }
 0x22c   :  { %v678_v11 = vsub.f32 %v2582_v33, %v621_v32  ;;  %v3026_v21 = vsub.f32 %v2568_v22, %v646_v23  ;;  %2123 = vpow2.f32 %v711_v41 }
 0x22e   :  { %v709_v18 = vmul.f32 1.442695, %v3026_v21  ;;  %v935_v6 = vsel %vm3464_vm9, %v678_v11, 0.0  ;;  %v2114_v44 = vpop.eup %2113  ;;  %v699_v30 = vmul.f32 1.442695, %v678_v11  ;;  %vm3471_vm9 = vnez %v3413_v48 }
 0x22f   :  { %v661_v24 = vpop.permute.xlu1 %660  ;;  %956 = vadd.xlane.f32.xlu0 %v935_v6  ;;  %v616_v19 = vpop.permute.xlu0 %615  ;;  %v730_v22 = vsel %vm2823_vm13, %v2114_v44, 0.0  ;;  %vm3465_vm13 = vnez %v3376_v59 }
 0x230   :  { %v677_v4 = vsub.f32 %v2584_v34, %v616_v19  ;;  %2125 = vpow2.f32 %v709_v18  ;;  %v2116_v5 = vpop.eup %2115  ;;  %v686_v34 = vsub.f32 %v2589_v39, %v661_v24 }
 0x231   :  { %v2118_v61 = vpop.eup %2117  ;;  %2127 = vpow2.f32 %v693_v58 }
 0x232   :  { %v697_v33 = vmul.f32 1.442695, %v677_v4  ;;  %v934_v8 = vsel %vm2861_vm1, %v677_v4, 0.0  ;;  %v2120_v14 = vpop.eup %2119  ;;  %v721_v13 = vsel %vm3465_vm13, %v2118_v61, 0.0  ;;  %vm3466_vm1 = vnez %v3380_v47 }
 0x233   :  { %787 = vadd.xlane.f32.xlu0 %v730_v22  ;;  %954 = vadd.xlane.f32.xlu1 %v934_v8  ;;  %v656_v38 = vpop.permute.xlu0 %655  ;;  %v631_v12 = vpop.permute.xlu1 %630  ;;  %v722_v9 = vsel %vm3466_vm1, %v2116_v5, 0.0  ;;  %v715_v23 = vmul.f32 1.442695, %v686_v34  ;;  %v724_v11 = vsel %vm3467_vm10, %v2120_v14, 0.0  ;;  %vm3472_vm13 = vnez %v3404_v55  ;;  %v3077_v8 = vld [vmem:[#allocation5 + $0x18] sm:$0xff] }
 0x234   :  { %v3037_v49 = vsub.f32 %v2591_v40, %v656_v38  ;;  %2129 = vpow2.f32 %v697_v33  ;;  %v2122_v32 = vpop.eup %2121  ;;  %v680_v40 = vsub.f32 %v2607_v46, %v631_v12  ;;  %vm3474_vm1 = vnez %v3415_v1  ;;  %v3083_v38 = vld [vmem:[#allocation5 + $0x28] sm:$0xff]  ;;  %v3092_v12 = vld [vmem:[#allocation5 + $0x10] sm:$0xff] }
 0x235   :  { %2131 = vpow2.f32 %v699_v30  ;;  %v729_v59 = vsel %vm3468_vm7, %v2122_v32, 0.0  ;;  %vm3478_vm10 = vcmask 7168  }
 0x236   :  { %v713_v62 = vmul.f32 1.442695, %v3037_v49  ;;  %v2124_v41 = vpop.eup %2123  ;;  %v703_v47 = vmul.f32 1.442695, %v680_v40  ;;  %v937_v57 = vsel %vm3474_vm1, %v680_v40, 0.0  ;;  %vm3479_vm7 = vmmov %vm3478_vm10  ;;  %v3104_v40 = vld [vmem:[#allocation5 + $0x58] sm:$0xff] }
 0x237   :  { %769 = vadd.xlane.f32.xlu0 %v721_v13  ;;  %771 = vadd.xlane.f32.xlu1 %v722_v9  ;;  %v671_v39 = vpop.permute.xlu1 %670  ;;  %v732_v46 = vsel %vm3469_vm5, %v2124_v41, 0.0  ;;  %vm3480_vm5 = vmmov %vm3479_vm7  ;;  %v3100_v9 = vld [vmem:[#allocation5 + $0x20] sm:$0xff]  ;;  %v942_v15 = vsel %vm2974_vm15, %v3037_v49, 0.0 }
 0x238   :  { %2133 = vpow2.f32 %v713_v62  ;;  %v688_v6 = vsub.f32 %v2623_v50, %v671_v39  ;;  %v3096_v62 = vld [vmem:[#allocation5 + $0x48] sm:$0xff]  ;;  %v3496_v49 = vld [vmem:[#allocation9_spill] sm:$0xff] }
 0x239   :  { %2135 = vpow2.f32 %v715_v23 }
 0x23a   :  { %v2126_v18 = vpop.eup %2125  ;;  %2137 = vpow2.f32 %v703_v47  ;;  %v719_v42 = vmul.f32 1.442695, %v688_v6  ;;  %v3112_v47 = vld [vmem:[#allocation5 + $0x68] sm:$0xff] }
 0x23b   :  { %775 = vadd.xlane.f32.xlu0 %v724_v11  ;;  %785 = vadd.xlane.f32.xlu1 %v729_v59  ;;  %v2128_v44 = vpop.eup %2127  ;;  %v731_v24 = vsel %vm2933_vm14, %v2126_v18, 0.0  ;;  %vm3473_vm14 = vnez %v3409_v27  ;;  %v3108_v11 = vld [vmem:[#allocation5 + $0x30] sm:$0xff] }
 0x23c   :  { %v723_v58 = vsel %vm3470_vm4, %v2128_v44, 0.0  ;;  %2139 = vpow2.f32 %v719_v42  ;;  %vm3481_vm4 = vmmov %vm3480_vm5  ;;  %v3120_v42 = vld [vmem:[#allocation5 + $0x78] sm:$0xff] }
 0x23d   :  { %vm3486_vm1 = vmmov %vm3481_vm4 }
 0x23e   :  { %v2130_v19 = vpop.eup %2129 }
 0x23f   :  { %791 = vadd.xlane.f32.xlu0 %v732_v46  ;;  %789 = vadd.xlane.f32.xlu1 %v731_v24  ;;  %v2132_v10 = vpop.eup %2131  ;;  %v725_v4 = vsel %vm3471_vm9, %v2130_v19, 0.0  ;;  %vm3483_vm9 = vmmov %vm3481_vm4  ;;  %v3116_v46 = vld [vmem:[#allocation5 + $0x40] sm:$0xff] }
 0x240   :  { %v726_v29 = vsel %vm3472_vm13, %v2132_v10, 0.0  ;;  %vm3484_vm13 = vmmov %vm3481_vm4 }
 0x242   :  { %v2134_v50 = vpop.eup %2133 }
 0x243   :  { %773 = vadd.xlane.f32.xlu0 %v723_v58  ;;  %777 = vadd.xlane.f32.xlu1 %v725_v4  ;;  %v733_v17 = vsel %vm2961_vm3, %v2134_v50, 0.0  ;;  %v2136_v5 = vpop.eup %2135  ;;  %vm3475_vm3 = vnez %v3428_v7  ;;  %v3124_v4 = vld [vmem:[#allocation5 + $0x50] sm:$0xff] }
 0x244   :  { %v734_v20 = vsel %vm2897_vm11, %v2136_v5, 0.0  ;;  %v2138_v33 = vpop.eup %2137  ;;  %v939_v2 = vsel %vm3475_vm3, %v3002_v51, 0.0  ;;  %vm3476_vm11 = vnez %v3437_v37  ;;  %v945_v37 = vsel %vm2947_vm6, %v688_v6, 0.0  ;;  %vm3482_vm6 = vmmov %vm3481_vm4 }
 0x245   :  { %v728_v48 = vsel %vm3473_vm14, %v2138_v33, 0.0  ;;  %v941_v27 = vsel %vm3476_vm11, %v3017_v25, 0.0  ;;  %v3089_v25 = vld [vmem:[#allocation5 + $0x38] sm:$0xff]  ;;  %vm3485_vm14 = vmmov %vm3481_vm4 }
 0x246   :  { %v2140_v22 = vpop.eup %2139  ;;  %vm3487_vm3 = vmmov %vm3486_vm1 }
 0x247   :  { %779 = vadd.xlane.f32.xlu0 %v726_v29  ;;  %793 = vadd.xlane.f32.xlu1 %v733_v17  ;;  %v736_v55 = vsel %vm2925_vm8, %v2140_v22, 0.0  ;;  %vm3477_vm8 = vnez %v3444_v54  ;;  %vm3488_vm11 = vmmov %vm3486_vm1  ;;  %v3129_v17 = vld [vmem:[#allocation5 + $0x60] sm:$0xff]  ;;  %v3134_v22 = vld [vmem:[#allocation5 + $0x70] sm:$0xff] }
 0x248   :  { %v943_v1 = vsel %vm3477_vm8, %v686_v34, 0.0  ;;  %vm3489_vm8 = vmmov %vm3486_vm1 }
 0x24b   :  { %795 = vadd.xlane.f32.xlu0 %v734_v20 }
 0x24f   :  { %783 = vadd.xlane.f32.xlu0 %v728_v48 }
 0x253   :  { %799 = vadd.xlane.f32.xlu0 %v736_v55 }
 0x257   :  { %960 = vadd.xlane.f32.xlu0 %v937_v57 }
 0x25b   :  { %964 = vadd.xlane.f32.xlu0 %v939_v2 }
 0x25f   :  { %968 = vadd.xlane.f32.xlu0 %v941_v27 }
 0x260   :  { %v1065_v61 = vpop.xlane.xlu0 %1064 }
 0x261   :  { %v1093_v43 = vadd.f32 %v1065_v61, %v3077_v8 }
 0x263   :  { %972 = vadd.xlane.f32.xlu0 %v943_v1  ;;  %1109 = vst.msk [vmem:[#allocation5 + $0x18] sm:$0xff] %vm3478_vm10, %v1093_v43  ;;  %vm3490_vm10 = vmmov %vm3486_vm1 }
 0x264   :  { %v1069_v51 = vpop.xlane.xlu0 %1068 }
 0x265   :  { %v1095_v7 = vadd.f32 %v1069_v51, %v3083_v38 }
 0x267   :  { %976 = vadd.xlane.f32.xlu0 %v945_v37  ;;  %1111 = vst.msk [vmem:[#allocation5 + $0x28] sm:$0xff] %vm3479_vm7, %v1095_v7  ;;  %vm3491_vm7 = vmmov %vm3486_vm1 }
 0x268   :  { %v1073_v30 = vpop.xlane.xlu0 %1072 }
 0x269   :  { %v1097_v54 = vadd.f32 %v1073_v30, %v3089_v25  ;;  %v1063_v34 = vpop.xlane.xlu1 %1062  ;;  %v898_v30 = vmul.f32 %v2648_v3, %v2685_v53 }
 0x26a   :  { %v1092_v14 = vadd.f32 %v1063_v34, %v3092_v12 }
 0x26b   :  { %1113 = vst.msk [vmem:[#allocation5 + $0x38] sm:$0xff] %vm3480_vm5, %v1097_v54  ;;  %vm3492_vm5 = vnez %v3426_v28  ;;  %v940_v28 = vsel %vm2953_vm12, %v3026_v21, 0.0  ;;  %v579_v54 = vmul.f32 1.442695, %v2670_v31 }
 0x26c   :  { %v1077_v13 = vpop.xlane.xlu0 %1076  ;;  %1108 = vst.msk [vmem:[#allocation5 + $0x10] sm:$0xff] %vm3481_vm4, %v1092_v14  ;;  %vm3493_vm4 = vnez %v3435_v35  ;;  %v3495_v14 = vld [vmem:[#allocation11_spill] sm:$0xff] }
 0x26d   :  { %v1099_v16 = vadd.f32 %v1077_v13, %v3096_v62  ;;  %v1067_v32 = vpop.xlane.xlu1 %1066  ;;  %v901_v0 = vmul.f32 %v3077_v8, %v3495_v14  ;;  %v563_v13 = vmul.f32 1.442695, %v3496_v49  ;;  %v3500_v8 = vld [vmem:[#allocation10_spill] sm:$0xff] }
 0x26e   :  { %v1094_v23 = vadd.f32 %v1067_v32, %v3100_v9  ;;  %v869_v32 = vld [vmem:[#allocation4 + $0x18] sm:$0xff] }
 0x26f   :  { %1115 = vst.msk [vmem:[#allocation5 + $0x48] sm:$0xff] %vm3482_vm6, %v1099_v16  ;;  %vm3494_vm6 = vnez %v3442_v36  ;;  %v866_v36 = vld [vmem:[#allocation4] sm:$0xff] }
 0x270   :  { %v1081_v41 = vpop.xlane.xlu0 %1080  ;;  %1110 = vst.msk [vmem:[#allocation5 + $0x20] sm:$0xff] %vm3483_vm9, %v1094_v23  ;;  %v914_v34 = vadd.f32 %v898_v30, %v866_v36  ;;  %v561_v23 = vmul.f32 1.442695, %v2685_v53  ;;  %v3501_v53 = vld [vmem:[#allocation15_spill] sm:$0xff] }
 0x271   :  { %v1101_v39 = vadd.f32 %v1081_v41, %v3104_v40  ;;  %v1071_v59 = vpop.xlane.xlu1 %1070  ;;  %v3498_v41 = vld [vmem:[#allocation12_spill] sm:$0xff]  ;;  %v571_v30 = vmul.f32 1.442695, %v3501_v53 }
 0x272   :  { %v1096_v18 = vadd.f32 %v1071_v59, %v3108_v11  ;;  %v868_v59 = vld [vmem:[#allocation4 + $0x10] sm:$0xff] }
 0x273   :  { %1117 = vst.msk [vmem:[#allocation5 + $0x58] sm:$0xff] %vm3484_vm13, %v1101_v39  ;;  %v900_v39 = vmul.f32 %v3092_v12, %v3498_v41  ;;  %v871_v12 = vld [vmem:[#allocation4 + $0x28] sm:$0xff] }
 0x274   :  { %v1085_v6 = vpop.xlane.xlu0 %1084  ;;  %1112 = vst.msk [vmem:[#allocation5 + $0x30] sm:$0xff] %vm3485_vm14, %v1096_v18  ;;  %v577_v18 = vmul.f32 1.442695, %v3500_v8 }
 0x275   :  { %v1103_v44 = vadd.f32 %v1085_v6, %v3112_v47  ;;  %v1075_v24 = vpop.xlane.xlu1 %1074 }
 0x276   :  { %v1098_v19 = vadd.f32 %v1075_v24, %v3116_v46 }
 0x277   :  { %1119 = vst.msk [vmem:[#allocation5 + $0x68] sm:$0xff] %vm3486_vm1, %v1103_v44  ;;  %v567_v44 = vmul.f32 1.442695, %v3495_v14 }
 0x278   :  { %v1089_v10 = vpop.xlane.xlu0 %1088  ;;  %1114 = vst.msk [vmem:[#allocation5 + $0x40] sm:$0xff] %vm3487_vm3, %v1098_v19  ;;  %v916_v19 = vadd.f32 %v900_v39, %v868_v59 }
 0x279   :  { %v1105_v58 = vadd.f32 %v1089_v10, %v3120_v42  ;;  %v1079_v50 = vpop.xlane.xlu1 %1078  ;;  %v903_v10 = vmul.f32 %v3083_v38, %v3501_v53  ;;  %v870_v38 = vld [vmem:[#allocation4 + $0x20] sm:$0xff] }
 0x27a   :  { %v1100_v29 = vadd.f32 %v1079_v50, %v3124_v4  ;;  %v3503_v50 = vld [vmem:[#allocation13_spill] sm:$0xff] }
 0x27b   :  { %1121 = vst.msk [vmem:[#allocation5 + $0x78] sm:$0xff] %vm3488_vm11, %v1105_v58 }
 0x27c   :  { %1116 = vst.msk [vmem:[#allocation5 + $0x50] sm:$0xff] %vm3489_vm8, %v1100_v29  ;;  %v583_v29 = vmul.f32 1.442695, %v3503_v50 }
 0x27d   :  { %v1083_v5 = vpop.xlane.xlu1 %1082 }
 0x27e   :  { %v1102_v20 = vadd.f32 %v1083_v5, %v3129_v17 }
 0x280   :  { %v626_v33 = vpop.permute.xlu0 %625  ;;  %1118 = vst.msk [vmem:[#allocation5 + $0x60] sm:$0xff] %vm3490_vm10, %v1102_v20  ;;  %v3504_v20 = vld [vmem:[#allocation14_spill] sm:$0xff] }
 0x281   :  { %v679_v48 = vsub.f32 %v2628_v52, %v626_v33  ;;  %v1087_v55 = vpop.xlane.xlu1 %1086  ;;  %v581_v33 = vmul.f32 1.442695, %v3504_v20 }
 0x282   :  { %v1104_v57 = vadd.f32 %v1087_v55, %v3134_v22  ;;  %v3506_v55 = vld [vmem:[#allocation16_spill] sm:$0xff] }
 0x283   :  { %v701_v2 = vmul.f32 1.442695, %v679_v48  ;;  %v936_v37 = vsel %vm3493_vm4, %v679_v48, 0.0  ;;  %v919_v48 = vadd.f32 %v903_v10, %v871_v12 }
 0x284   :  { %v666_v27 = vpop.permute.xlu0 %665  ;;  %1120 = vst.msk [vmem:[#allocation5 + $0x70] sm:$0xff] %vm3491_vm7, %v1104_v57  ;;  %v902_v57 = vmul.f32 %v3100_v9, %v3506_v55  ;;  %v738_v9 = vld [vmem:[#allocation3 + $0x8] sm:$0xff] }
 0x285   :  { %2141 = vpow2.f32 %v701_v2  ;;  %v687_v61 = vsub.f32 %v2638_v60, %v666_v27  ;;  %v938_v60 = vsel %vm3494_vm6, %v3012_v56, 0.0  ;;  %v867_v56 = vld [vmem:[#allocation4 + $0x8] sm:$0xff] }
 0x286   :  { %v915_v21 = vadd.f32 %v2680_v45, %v867_v56  ;;  %v917_v45 = vadd.f32 %v901_v0, %v869_v32 }
 0x287   :  { %v717_v43 = vmul.f32 1.442695, %v687_v61  ;;  %v944_v35 = vsel %vm2991_vm2, %v687_v61, 0.0  ;;  %v746_v61 = vld [vmem:[#allocation3 + $0x48] sm:$0xff] }
 0x289   :  { %2143 = vpow2.f32 %v717_v43  ;;  %v565_v43 = vmul.f32 1.442695, %v3498_v41 }
 0x28a   :  { %2145 = vpow2.f32 %v579_v54  ;;  %v3508_v54 = vld [vmem:[#allocation18_spill] sm:$0xff] }
 0x28b   :  { %2147 = vpow2.f32 %v563_v13 }
 0x28c   :  { %2149 = vpow2.f32 %v561_v23 }
 0x28d   :  { %2151 = vpow2.f32 %v577_v18 }
 0x28e   :  { %2153 = vpow2.f32 %v567_v44 }
 0x28f   :  { %v2142_v1 = vpop.eup %2141  ;;  %2155 = vpow2.f32 %v583_v29 }
 0x290   :  { %v727_v51 = vsel %vm3492_vm5, %v2142_v1, 0.0  ;;  %2157 = vpow2.f32 %v581_v33 }
 0x291   :  { %781 = vadd.xlane.f32.xlu1 %v727_v51  ;;  %v569_v51 = vmul.f32 1.442695, %v3506_v55  ;;  %2159 = vpow2.f32 %v565_v43  ;;  %v3517_v55 = vld [vmem:[#allocation23_spill] sm:$0xff] }
 0x293   :  { %v2144_v52 = vpop.eup %2143  ;;  %2161 = vpow2.f32 %v569_v51 }
 0x294   :  { %v735_v7 = vsel %vm2982_vm0, %v2144_v52, 0.0  ;;  %vm3497_vm0 = vmmov %vm3486_vm1  ;;  %v2146_v2 = vpop.eup %2145  ;;  %2163 = vpow2.f32 %v571_v30 }
 0x295   :  { %797 = vadd.xlane.f32.xlu1 %v735_v7  ;;  %vm3499_vm12 = vmmov %vm3497_vm0  ;;  %v2148_v52 = vpop.eup %2147  ;;  %v918_v7 = vadd.f32 %v902_v57, %v870_v38  ;;  %v591_v57 = vmul.f32 1.442695, %v3517_v55  ;;  %v741_v38 = vld [vmem:[#allocation3 + $0x20] sm:$0xff] }
 0x296   :  { %vm3502_vm15 = vmmov %vm3497_vm0 }
 0x297   :  { %vm3505_vm2 = vmmov %vm3497_vm0 }
 0x298   :  { %vm3507_vm9 = vmmov %vm3497_vm0 }
 0x299   :  { %958 = vadd.xlane.f32.xlu1 %v936_v37  ;;  %v762_v37 = vmul.f32 %v2146_v2, %v746_v61  ;;  %vm3509_vm13 = vmmov %vm3497_vm0  ;;  %v739_v61 = vld [vmem:[#allocation3 + $0x10] sm:$0xff] }
 0x29a   :  { %vm3510_vm14 = vmmov %vm3497_vm0 }
 0x29b   :  { %vm3512_vm1 = vmmov %vm3497_vm0 }
 0x29c   :  { %vm3513_vm3 = vmmov %vm3497_vm0 }
 0x29d   :  { %962 = vadd.xlane.f32.xlu1 %v938_v60  ;;  %v2150_v60 = vpop.eup %2149  ;;  %vm3515_vm11 = vmmov %vm3497_vm0 }
 0x29e   :  { %vm3516_vm8 = vmmov %vm3497_vm0 }
 0x29f   :  { %vm3518_vm10 = vmmov %vm3497_vm0 }
 0x2a0   :  { %vm3519_vm7 = vmmov %vm3497_vm0 }
 0x2a1   :  { %966 = vadd.xlane.f32.xlu1 %v940_v28  ;;  %vm3520_vm5 = vmmov %vm3497_vm0 }
 0x2a2   :  { %vm3521_vm4 = vmmov %vm3497_vm0 }
 0x2a3   :  { %vm3522_vm6 = vmmov %vm3497_vm0 }
 0x2a5   :  { %970 = vadd.xlane.f32.xlu1 %v942_v15 }
 0x2a9   :  { %974 = vadd.xlane.f32.xlu1 %v944_v35  ;;  %v737_v35 = vld [vmem:[#allocation3] sm:$0xff] }
 0x2aa   :  { %v753_v14 = vmul.f32 %v2150_v60, %v737_v35  ;;  %v1818_v35 = vld [vmem:[#allocation5 + $0x8] sm:$0xff] }
 0x2b0   :  { %v947_v63 = vpop.xlane.xlu1 %946 }
 0x2b1   :  { %v978_v16 = vadd.f32 %v947_v63, %v914_v34  ;;  %v949_v26 = vpop.xlane.xlu0 %948  ;;  %v585_v34 = vmul.f32 1.442695, %v3508_v54  ;;  %v2152_v63 = vpop.eup %2151 }
 0x2b2   :  { %v979_v3 = vadd.f32 %v949_v26, %v915_v21  ;;  %v754_v21 = vmul.f32 %v2148_v52, %v738_v9  ;;  %v2154_v0 = vpop.eup %2153  ;;  %v740_v26 = vld [vmem:[#allocation3 + $0x18] sm:$0xff] }
 0x2b3   :  { %994 = vst.msk [vmem:[#allocation4] sm:$0xff] %vm3497_vm0, %v978_v16  ;;  %v745_v16 = vld [vmem:[#allocation3 + $0x40] sm:$0xff]  ;;  %2165 = vpow2.f32 %v585_v34  ;;  %v2156_v39 = vpop.eup %2155  ;;  %v756_v59 = vmul.f32 %v2154_v0, %v740_v26  ;;  %v742_v34 = vld [vmem:[#allocation3 + $0x28] sm:$0xff] }
 0x2b4   :  { %995 = vst.msk [vmem:[#allocation4 + $0x8] sm:$0xff] %vm3499_vm12, %v979_v3  ;;  %v3511_v3 = vld [vmem:[#allocation17_spill] sm:$0xff]  ;;  %v2158_v18 = vpop.eup %2157  ;;  %vm3523_vm12 = vmmov %vm3497_vm0 }
 0x2b5   :  { %v953_v6 = vpop.xlane.xlu0 %952  ;;  %v587_v41 = vmul.f32 1.442695, %v3511_v3  ;;  %v2160_v29 = vpop.eup %2159 }
 0x2b6   :  { %v981_v24 = vadd.f32 %v953_v6, %v917_v45  ;;  %v761_v45 = vmul.f32 %v2152_v63, %v745_v16  ;;  %v1817_v63 = vld [vmem:[#allocation5] sm:$0xff] }
 0x2b7   :  { %2167 = vpow2.f32 %v587_v41 }
 0x2b8   :  { %997 = vst.msk [vmem:[#allocation4 + $0x18] sm:$0xff] %vm3502_vm15, %v981_v24  ;;  %v951_v58 = vpop.xlane.xlu1 %950  ;;  %v747_v24 = vld [vmem:[#allocation3 + $0x50] sm:$0xff]  ;;  %vm3524_vm15 = vmmov %vm3497_vm0 }
 0x2b9   :  { %v980_v5 = vadd.f32 %v951_v58, %v916_v19  ;;  %v748_v19 = vld [vmem:[#allocation3 + $0x58] sm:$0xff] }
 0x2ba   :  { %v3514_v58 = vld [vmem:[#allocation20_spill] sm:$0xff]  ;;  %v764_v33 = vmul.f32 %v2156_v39, %v748_v19 }
 0x2bb   :  { %996 = vst.msk [vmem:[#allocation4 + $0x10] sm:$0xff] %vm3505_vm2, %v980_v5  ;;  %v575_v12 = vmul.f32 1.442695, %v3514_v58  ;;  %v763_v5 = vmul.f32 %v2158_v18, %v747_v24  ;;  %vm3525_vm2 = vmmov %vm3497_vm0 }
 0x2bc   :  { %v957_v27 = vpop.xlane.xlu0 %956 }
 0x2bd   :  { %v983_v1 = vadd.f32 %v957_v27, %v919_v48  ;;  %v2162_v48 = vpop.eup %2161  ;;  %2169 = vpow2.f32 %v575_v12  ;;  %v744_v12 = vld [vmem:[#allocation3 + $0x38] sm:$0xff] }
 0x2be   :  { %2171 = vpow2.f32 %v591_v57 }
 0x2bf   :  { %999 = vst.msk [vmem:[#allocation4 + $0x28] sm:$0xff] %vm3507_vm9, %v983_v1  ;;  %vm3526_vm9 = vmmov %vm3497_vm0 }
 0x2c0   :  { %v955_v28 = vpop.xlane.xlu1 %954  ;;  %v788_v15 = vpop.xlane.xlu0 %787 }
 0x2c1   :  { %v982_v36 = vadd.f32 %v955_v28, %v918_v7  ;;  %v810_v56 = vadd.f32 %v788_v15, %v762_v37  ;;  %v2164_v7 = vpop.eup %2163  ;;  %v757_v28 = vmul.f32 %v2162_v48, %v741_v38  ;;  %v755_v15 = vmul.f32 %v2160_v29, %v739_v61  ;;  %v3201_v48 = vld [vmem:[#allocation5 + $0x10] sm:$0xff] }
 0x2c2   :  { %v2166_v9 = vpop.eup %2165  ;;  %v758_v26 = vmul.f32 %v2164_v7, %v742_v34  ;;  %v905_v34 = vmul.f32 %v3089_v25, %v3514_v58 }
 0x2c3   :  { %998 = vst.msk [vmem:[#allocation4 + $0x20] sm:$0xff] %vm3509_vm13, %v982_v36  ;;  %vm3527_vm13 = vmmov %vm3497_vm0 }
 0x2c4   :  { %827 = vst.msk [vmem:[#allocation3 + $0x48] sm:$0xff] %vm3510_vm14, %v810_v56  ;;  %v772_v49 = vpop.xlane.xlu1 %771  ;;  %v770_v13 = vpop.xlane.xlu0 %769  ;;  %v749_v56 = vld [vmem:[#allocation3 + $0x60] sm:$0xff]  ;;  %vm3528_vm14 = vmmov %vm3497_vm0 }
 0x2c5   :  { %v802_v32 = vadd.f32 %v772_v49, %v754_v21  ;;  %v801_v23 = vadd.f32 %v770_v13, %v753_v14  ;;  %v1866_v49 = vadd.f32 1e-12, %v1818_v35  ;;  %v765_v16 = vmul.f32 %v2166_v9, %v749_v56 }
 0x2c7   :  { %819 = vst.msk [vmem:[#allocation3 + $0x8] sm:$0xff] %vm3512_vm1, %v802_v32  ;;  %v2168_v32 = vpop.eup %2167  ;;  %vm3529_vm1 = vmmov %vm3497_vm0 }
 0x2c8   :  { %818 = vst.msk [vmem:[#allocation3] sm:$0xff] %vm3513_vm3, %v801_v23  ;;  %v786_v6 = vpop.xlane.xlu1 %785  ;;  %v776_v44 = vpop.xlane.xlu0 %775  ;;  %v1865_v23 = vadd.f32 1e-12, %v1817_v63  ;;  %vm3530_vm3 = vmmov %vm3497_vm0 }
 0x2c9   :  { %v809_v53 = vadd.f32 %v786_v6, %v761_v45  ;;  %v804_v10 = vadd.f32 %v776_v44, %v756_v59  ;;  %v750_v45 = vld [vmem:[#allocation3 + $0x68] sm:$0xff]  ;;  %v3196_v59 = vld [vmem:[#allocation5 + $0x18] sm:$0xff]  ;;  %v2170_v24 = vpop.eup %2169 }
 0x2ca   :  { %v766_v44 = vmul.f32 %v2168_v32, %v750_v45  ;;  %v1868_v19 = vadd.f32 1e-12, %v3196_v59  ;;  %v3211_v32 = vld [vmem:[#allocation5 + $0x28] sm:$0xff] }
 0x2cb   :  { %826 = vst.msk [vmem:[#allocation3 + $0x40] sm:$0xff] %vm3515_vm11, %v809_v53  ;;  %v1746_v53 = vld [vmem:[#allocation3 + $0x48] sm:$0xff]  ;;  %vm3531_vm11 = vmmov %vm3497_vm0 }
 0x2cc   :  { %821 = vst.msk [vmem:[#allocation3 + $0x18] sm:$0xff] %vm3516_vm8, %v804_v10  ;;  %v790_v2 = vpop.xlane.xlu1 %789  ;;  %v792_v27 = vpop.xlane.xlu0 %791  ;;  %v1762_v38 = vadd.f32 1e-12, %v1746_v53  ;;  %vm3532_vm8 = vmmov %vm3497_vm0 }
 0x2cd   :  { %v811_v43 = vadd.f32 %v790_v2, %v763_v5  ;;  %v812_v1 = vadd.f32 %v792_v27, %v764_v33  ;;  %v752_v5 = vld [vmem:[#allocation3 + $0x78] sm:$0xff]  ;;  %v2172_v33 = vpop.eup %2171 }
 0x2ce   :  { %v1738_v51 = vld [vmem:[#allocation3 + $0x8] sm:$0xff]  ;;  %v768_v56 = vmul.f32 %v2172_v33, %v752_v5  ;;  %v1804_v5 = vld [vmem:[#allocation4 + $0x18] sm:$0xff] }
 0x2cf   :  { %v1737_v52 = vld [vmem:[#allocation3] sm:$0xff]  ;;  %v1754_v37 = vadd.f32 1e-12, %v1738_v51  ;;  %828 = vst.msk [vmem:[#allocation3 + $0x50] sm:$0xff] %vm3518_vm10, %v811_v43  ;;  %vm3533_vm10 = vmmov %vm3497_vm0 }
 0x2d0   :  { %v1753_v60 = vadd.f32 1e-12, %v1737_v52  ;;  %829 = vst.msk [vmem:[#allocation3 + $0x58] sm:$0xff] %vm3519_vm7, %v812_v1  ;;  %v778_v30 = vpop.xlane.xlu1 %777  ;;  %v774_v36 = vpop.xlane.xlu0 %773  ;;  %v760_v1 = vmul.f32 %v2170_v24, %v744_v12  ;;  %v3204_v52 = vld [vmem:[#allocation5 + $0x20] sm:$0xff]  ;;  %v907_v24 = vmul.f32 %v3096_v62, %v2670_v31  ;;  %v875_v12 = vld [vmem:[#allocation4 + $0x48] sm:$0xff]  ;;  %vm3534_vm7 = vmmov %vm3497_vm0 }
 0x2d1   :  { %2173 = vlog2.f32 %v1754_v37  ;;  %v805_v21 = vadd.f32 %v778_v30, %v757_v28  ;;  %v803_v14 = vadd.f32 %v774_v36, %v755_v15 }
 0x2d2   :  { %2175 = vlog2.f32 %v1753_v60  ;;  %v1867_v60 = vadd.f32 1e-12, %v3201_v48 }
 0x2d3   :  { %v1740_v0 = vld [vmem:[#allocation3 + $0x18] sm:$0xff]  ;;  %822 = vst.msk [vmem:[#allocation3 + $0x20] sm:$0xff] %vm3520_vm5, %v805_v21  ;;  %v1802_v21 = vld [vmem:[#allocation4 + $0x8] sm:$0xff]  ;;  %vm3535_vm5 = vmmov %vm3497_vm0 }
 0x2d4   :  { %v1756_v13 = vadd.f32 1e-12, %v1740_v0  ;;  %820 = vst.msk [vmem:[#allocation3 + $0x10] sm:$0xff] %vm3521_vm4, %v803_v14  ;;  %v794_v41 = vpop.xlane.xlu1 %793  ;;  %v780_v39 = vpop.xlane.xlu0 %779  ;;  %v1869_v14 = vadd.f32 1e-12, %v3204_v52  ;;  %vm3536_vm4 = vmmov %vm3497_vm0 }
 0x2d5   :  { %v813_v18 = vadd.f32 %v794_v41, %v765_v16  ;;  %v806_v6 = vadd.f32 %v780_v39, %v758_v26  ;;  %v1801_v26 = vld [vmem:[#allocation4] sm:$0xff] }
 0x2d6   :  { %2177 = vlog2.f32 %v1756_v13  ;;  %v873_v13 = vld [vmem:[#allocation4 + $0x38] sm:$0xff] }
 0x2d7   :  { %2179 = vrcp.f32 %v1866_v49  ;;  %830 = vst.msk [vmem:[#allocation3 + $0x60] sm:$0xff] %vm3522_vm6, %v813_v18  ;;  %v1748_v15 = vld [vmem:[#allocation3 + $0x58] sm:$0xff]  ;;  %vm3537_vm6 = vmmov %vm3497_vm0 }
 0x2d8   :  { %823 = vst.msk [vmem:[#allocation3 + $0x28] sm:$0xff] %vm3497_vm0, %v806_v6  ;;  %2181 = vrcp.f32 %v1865_v23  ;;  %v796_v10 = vpop.xlane.xlu0 %795  ;;  %v1764_v23 = vadd.f32 1e-12, %v1748_v15 }
 0x2d9   :  { %v814_v29 = vadd.f32 %v796_v10, %v766_v44  ;;  %2183 = vrcp.f32 %v1868_v19  ;;  %v921_v44 = vadd.f32 %v905_v34, %v873_v13  ;;  %v1870_v19 = vadd.f32 1e-12, %v3211_v32 }
 0x2da   :  { %v1741_v57 = vld [vmem:[#allocation3 + $0x20] sm:$0xff] }
 0x2db   :  { %v1739_v2 = vld [vmem:[#allocation3 + $0x10] sm:$0xff]  ;;  %v2174_v27 = vpop.eup %2173  ;;  %v1757_v61 = vadd.f32 1e-12, %v1741_v57  ;;  %831 = vst.msk [vmem:[#allocation3 + $0x68] sm:$0xff] %vm3523_vm12, %v814_v29  ;;  %v3218_v29 = vld [vmem:[#allocation5 + $0x48] sm:$0xff]  ;;  %vm3538_vm12 = vmmov %vm3497_vm0 }
 0x2dc   :  { %v1755_v43 = vadd.f32 1e-12, %v1739_v2  ;;  %v2176_v51 = vpop.eup %2175  ;;  %v1772_v7 = vmul.f32 0.6931472, %v2174_v27  ;;  %v784_v37 = vpop.xlane.xlu0 %783  ;;  %v923_v27 = vadd.f32 %v907_v24, %v875_v12  ;;  %v1806_v12 = vld [vmem:[#allocation4 + $0x28] sm:$0xff] }
 0x2dd   :  { %v1770_v28 = vmul.f32 0.6931472, %v2176_v51  ;;  %2185 = vlog2.f32 %v1757_v61  ;;  %v808_v9 = vadd.f32 %v784_v37, %v760_v1  ;;  %v909_v51 = vmul.f32 %v3104_v40, %v3503_v50 }
 0x2de   :  { %v1834_v30 = vmul.f32 %v1818_v35, %v1772_v7  ;;  %2187 = vlog2.f32 %v1755_v43  ;;  %v3232_v7 = vld [vmem:[#allocation5 + $0x58] sm:$0xff] }
 0x2df   :  { %v1742_v36 = vld [vmem:[#allocation3 + $0x28] sm:$0xff]  ;;  %2189 = vlog2.f32 %v1762_v38  ;;  %v1833_v0 = vmul.f32 %v1817_v63, %v1770_v28  ;;  %825 = vst.msk [vmem:[#allocation3 + $0x38] sm:$0xff] %vm3524_vm15, %v808_v9  ;;  %v1874_v38 = vadd.f32 1e-12, %v3218_v29  ;;  %v3234_v28 = vld [vmem:[#allocation5 + $0x38] sm:$0xff]  ;;  %vm3539_vm15 = vmmov %vm3497_vm0 }
 0x2e0   :  { %v1758_v49 = vadd.f32 1e-12, %v1742_v36  ;;  %v2178_v16 = vpop.eup %2177  ;;  %v1850_v35 = vsub.f32 %v1802_v21, %v1834_v30  ;;  %v800_v41 = vpop.xlane.xlu0 %799  ;;  %2191 = vrcp.f32 %v1867_v60  ;;  %v877_v9 = vld [vmem:[#allocation4 + $0x58] sm:$0xff]  ;;  %v1876_v34 = vadd.f32 1e-12, %v3232_v7  ;;  %v879_v21 = vld [vmem:[#allocation4 + $0x68] sm:$0xff] }
 0x2e1   :  { %v2180_v39 = vpop.eup %2179  ;;  %v1849_v45 = vsub.f32 %v1801_v26, %v1833_v0  ;;  %v1776_v25 = vmul.f32 0.6931472, %v2178_v16  ;;  %v816_v58 = vadd.f32 %v800_v41, %v768_v56  ;;  %v1872_v26 = vadd.f32 1e-12, %v3234_v28  ;;  %v1803_v41 = vld [vmem:[#allocation4 + $0x10] sm:$0xff] }
 0x2e2   :  { %v2182_v18 = vpop.eup %2181  ;;  %v1898_v6 = vmul.f32 %v2180_v39, %v1850_v35  ;;  %2193 = vlog2.f32 %v1758_v49  ;;  %v1750_v63 = vld [vmem:[#allocation3 + $0x68] sm:$0xff]  ;;  %v1805_v49 = vld [vmem:[#allocation4 + $0x20] sm:$0xff]  ;;  %v925_v35 = vadd.f32 %v909_v51, %v877_v9 }
 0x2e3   :  { %2195 = vrcp.f32 %v1869_v14  ;;  %v1897_v53 = vmul.f32 %v2182_v18, %v1849_v45  ;;  %v1836_v10 = vmul.f32 %v3196_v59, %v1776_v25  ;;  %833 = vst.msk [vmem:[#allocation3 + $0x78] sm:$0xff] %vm3525_vm2, %v816_v58  ;;  %v1766_v33 = vadd.f32 1e-12, %v1750_v63  ;;  %v2184_v57 = vpop.eup %2183  ;;  %vm3540_vm2 = vmmov %vm3497_vm0 }
 0x2e4   :  { %1915 = vst.msk [vmem:[%s3335_s4 + $0x8] sm:$0xff] %vm3526_vm9, %v1898_v6  ;;  %2197 = vlog2.f32 %v1764_v23  ;;  %v961_v31 = vpop.xlane.xlu0 %960  ;;  %v911_v14 = vmul.f32 %v3112_v47, %v3511_v3  ;;  %v1830_v23 = vld [vmem:[#allocation5 + $0x68] sm:$0xff]  ;;  %vm3545_vm9 = vmmov %vm3497_vm0 }
 0x2e5   :  { %1914 = vst.msk [vmem:[%s3335_s4] sm:$0xff] %vm3527_vm13, %v1897_v53  ;;  %v1852_v62 = vsub.f32 %v1804_v5, %v1836_v10  ;;  %v985_v59 = vadd.f32 %v961_v31, %v921_v44  ;;  %2199 = vrcp.f32 %v1870_v19  ;;  %v1878_v44 = vadd.f32 1e-12, %v1830_v23  ;;  %v1832_v10 = vld [vmem:[#allocation5 + $0x78] sm:$0xff]  ;;  %vm3546_vm13 = vmmov %vm3497_vm0 }
 0x2e6   :  { %v1744_v2 = vld [vmem:[#allocation3 + $0x38] sm:$0xff]  ;;  %2201 = vlog2.f32 %v1766_v33  ;;  %v913_v53 = vmul.f32 %v3120_v42, %v3517_v55 }
 0x2e7   :  { %v2186_v61 = vpop.eup %2185  ;;  %v1900_v43 = vmul.f32 %v2184_v57, %v1852_v62  ;;  %v1760_v1 = vadd.f32 1e-12, %v1744_v2  ;;  %1001 = vst.msk [vmem:[#allocation4 + $0x38] sm:$0xff] %vm3528_vm14, %v985_v59  ;;  %v881_v33 = vld [vmem:[#allocation4 + $0x78] sm:$0xff]  ;;  %v1880_v2 = vadd.f32 1e-12, %v1832_v10  ;;  %vm3547_vm14 = vmmov %vm3497_vm0 }
 0x2e8   :  { %v2188_v37 = vpop.eup %2187  ;;  %v1778_v60 = vmul.f32 0.6931472, %v2186_v61  ;;  %v965_v15 = vpop.xlane.xlu0 %964 }
 0x2e9   :  { %v2190_v30 = vpop.eup %2189  ;;  %1917 = vst.msk [vmem:[%s3335_s4 + $0x18] sm:$0xff] %vm3529_vm1, %v1900_v43  ;;  %v1774_v36 = vmul.f32 0.6931472, %v2188_v37  ;;  %2203 = vlog2.f32 %v1760_v1  ;;  %v987_v56 = vadd.f32 %v965_v15, %v923_v27  ;;  %v929_v43 = vadd.f32 %v913_v53, %v881_v33  ;;  %v751_v33 = vld [vmem:[#allocation3 + $0x70] sm:$0xff]  ;;  %vm3548_vm1 = vmmov %vm3497_vm0 }
 0x2ea   :  { %v1837_v40 = vmul.f32 %v3204_v52, %v1778_v60  ;;  %v1752_v50 = vld [vmem:[#allocation3 + $0x78] sm:$0xff]  ;;  %2205 = vrcp.f32 %v1874_v38  ;;  %v2192_v0 = vpop.eup %2191  ;;  %v1788_v39 = vmul.f32 0.6931472, %v2190_v30 }
 0x2eb   :  { %v1835_v13 = vmul.f32 %v3201_v48, %v1774_v36  ;;  %v1768_v16 = vadd.f32 1e-12, %v1752_v50  ;;  %1003 = vst.msk [vmem:[#allocation4 + $0x48] sm:$0xff] %vm3530_vm3, %v987_v56  ;;  %v927_v48 = vadd.f32 %v911_v14, %v879_v21  ;;  %vm3549_vm3 = vmmov %vm3497_vm0 }
 0x2ec   :  { %v2194_v52 = vpop.eup %2193  ;;  %v1853_v45 = vsub.f32 %v1805_v49, %v1837_v40  ;;  %v969_v25 = vpop.xlane.xlu0 %968  ;;  %v1842_v59 = vmul.f32 %v3218_v29, %v1788_v39 }
 0x2ed   :  { %v2196_v58 = vpop.eup %2195  ;;  %v1851_v18 = vsub.f32 %v1803_v41, %v1835_v13  ;;  %v1780_v6 = vmul.f32 0.6931472, %v2194_v52  ;;  %2207 = vlog2.f32 %v1768_v16  ;;  %v989_v47 = vadd.f32 %v969_v25, %v925_v35  ;;  %v3541_v25 = vld [vmem:[#allocation21_spill] sm:$0xff] }
 0x2ee   :  { %v2198_v3 = vpop.eup %2197  ;;  %v1901_v63 = vmul.f32 %v2196_v58, %v1853_v45  ;;  %2209 = vrcp.f32 %v1876_v34  ;;  %v1808_v40 = vld [vmem:[#allocation4 + $0x38] sm:$0xff]  ;;  %v3542_v58 = vld [vmem:[#allocation19_spill] sm:$0xff] }
 0x2ef   :  { %v1899_v24 = vmul.f32 %v2192_v0, %v1851_v18  ;;  %v1838_v19 = vmul.f32 %v3211_v32, %v1780_v6  ;;  %2211 = vrcp.f32 %v1872_v26  ;;  %1005 = vst.msk [vmem:[#allocation4 + $0x58] sm:$0xff] %vm3531_vm11, %v989_v47  ;;  %v2200_v31 = vpop.eup %2199  ;;  %v1792_v62 = vmul.f32 0.6931472, %v2198_v3  ;;  %v3543_v47 = vld [vmem:[#allocation24_spill] sm:$0xff]  ;;  %v3544_v3 = vld [vmem:[#allocation22_spill] sm:$0xff]  ;;  %vm3550_vm11 = vmmov %vm3497_vm0 }
 0x2f0   :  { %1918 = vst.msk [vmem:[%s3335_s4 + $0x20] sm:$0xff] %vm3532_vm8, %v1901_v63  ;;  %v973_v5 = vpop.xlane.xlu0 %972  ;;  %v2202_v55 = vpop.eup %2201  ;;  %2213 = vrcp.f32 %v1878_v44  ;;  %v551_v18 = vsub.f32 %v3542_v58, %v3541_v25  ;;  %v3292_v63 = vsub.f32 %v3544_v3, %v3543_v47  ;;  %vm3551_vm8 = vmmov %vm3497_vm0 }
 0x2f1   :  { %1916 = vst.msk [vmem:[%s3335_s4 + $0x10] sm:$0xff] %vm3533_vm10, %v1899_v24  ;;  %v1854_v32 = vsub.f32 %v1806_v12, %v1838_v19  ;;  %v991_v42 = vadd.f32 %v973_v5, %v927_v48  ;;  %v1796_v29 = vmul.f32 0.6931472, %v2202_v55  ;;  %v1844_v15 = vmul.f32 %v3232_v7, %v1792_v62  ;;  %v743_v24 = vld [vmem:[#allocation3 + $0x30] sm:$0xff]  ;;  %v1745_v19 = vld [vmem:[#allocation3 + $0x40] sm:$0xff]  ;;  %vm3552_vm10 = vmmov %vm3497_vm0 }
 0x2f2   :  { %v1810_v57 = vld [vmem:[#allocation4 + $0x48] sm:$0xff]  ;;  %2215 = vrcp.f32 %v1880_v2  ;;  %v573_v6 = vmul.f32 1.442695, %v551_v18  ;;  %v589_v48 = vmul.f32 1.442695, %v3292_v63  ;;  %v1749_v2 = vld [vmem:[#allocation3 + $0x60] sm:$0xff] }
 0x2f3   :  { %v2204_v27 = vpop.eup %2203  ;;  %v1902_v38 = vmul.f32 %v2200_v31, %v1854_v32  ;;  %v1858_v61 = vsub.f32 %v1810_v57, %v1842_v59  ;;  %1007 = vst.msk [vmem:[#allocation4 + $0x68] sm:$0xff] %vm3534_vm7, %v991_v42  ;;  %v1846_v49 = vmul.f32 %v1830_v23, %v1796_v29  ;;  %v1761_v12 = vadd.f32 1e-12, %v1745_v19  ;;  %v1747_v31 = vld [vmem:[#allocation3 + $0x50] sm:$0xff]  ;;  %vm3553_vm7 = vmmov %vm3497_vm0 }
 0x2f4   :  { %v2206_v1 = vpop.eup %2205  ;;  %v1784_v51 = vmul.f32 0.6931472, %v2204_v27  ;;  %v977_v37 = vpop.xlane.xlu0 %976  ;;  %2217 = vpow2.f32 %v573_v6  ;;  %v904_v59 = vmul.f32 %v3108_v11, %v551_v18  ;;  %v1763_v42 = vadd.f32 1e-12, %v1747_v31  ;;  %v872_v57 = vld [vmem:[#allocation4 + $0x30] sm:$0xff] }
 0x2f5   :  { %1919 = vst.msk [vmem:[%s3335_s4 + $0x28] sm:$0xff] %vm3535_vm5, %v1902_v38  ;;  %v1906_v60 = vmul.f32 %v2206_v1, %v1858_v61  ;;  %v993_v9 = vadd.f32 %v977_v37, %v929_v43  ;;  %2219 = vpow2.f32 %v589_v48  ;;  %v906_v61 = vmul.f32 %v3116_v46, %v3500_v8  ;;  %v1825_v43 = vld [vmem:[#allocation5 + $0x40] sm:$0xff]  ;;  %v876_v46 = vld [vmem:[#allocation4 + $0x50] sm:$0xff]  ;;  %vm3554_vm5 = vmmov %vm3497_vm0 }
 0x2f6   :  { %v1840_v30 = vmul.f32 %v3234_v28, %v1784_v51  ;;  %v1812_v36 = vld [vmem:[#allocation4 + $0x58] sm:$0xff]  ;;  %2221 = vlog2.f32 %v1761_v12  ;;  %v920_v38 = vadd.f32 %v904_v59, %v872_v57  ;;  %v1765_v1 = vadd.f32 1e-12, %v1749_v2  ;;  %v874_v37 = vld [vmem:[#allocation4 + $0x40] sm:$0xff] }
 0x2f7   :  { %v2208_v56 = vpop.eup %2207  ;;  %1923 = vst.msk [vmem:[%s3335_s4 + $0x48] sm:$0xff] %vm3536_vm4, %v1906_v60  ;;  %v1860_v50 = vsub.f32 %v1812_v36, %v1844_v15  ;;  %2223 = vlog2.f32 %v1763_v42  ;;  %v1873_v11 = vadd.f32 1e-12, %v1825_v43  ;;  %v1827_v36 = vld [vmem:[#allocation5 + $0x50] sm:$0xff]  ;;  %vm3555_vm4 = vmmov %vm3497_vm0 }
 0x2f8   :  { %1009 = vst.msk [vmem:[#allocation4 + $0x78] sm:$0xff] %vm3537_vm6, %v993_v9  ;;  %v2210_v34 = vpop.eup %2209  ;;  %v1856_v21 = vsub.f32 %v1808_v40, %v1840_v30  ;;  %v1800_v0 = vmul.f32 0.6931472, %v2208_v56  ;;  %v922_v9 = vadd.f32 %v906_v61, %v874_v37  ;;  %v908_v30 = vmul.f32 %v3124_v4, %v3504_v20  ;;  %v1823_v56 = vld [vmem:[#allocation5 + $0x30] sm:$0xff]  ;;  %v1829_v4 = vld [vmem:[#allocation5 + $0x60] sm:$0xff]  ;;  %vm3556_vm6 = vmmov %vm3497_vm0 }
 0x2f9   :  { %v2212_v14 = vpop.eup %2211  ;;  %v1908_v7 = vmul.f32 %v2210_v34, %v1860_v50  ;;  %2225 = vlog2.f32 %v1765_v1 }
 0x2fa   :  { %v1904_v13 = vmul.f32 %v2212_v14, %v1856_v21  ;;  %v1814_v28 = vld [vmem:[#allocation4 + $0x68] sm:$0xff]  ;;  %v2214_v26 = vpop.eup %2213  ;;  %v1848_v52 = vmul.f32 %v1832_v10, %v1800_v0  ;;  %v1875_v21 = vadd.f32 1e-12, %v1827_v36  ;;  %v1871_v0 = vadd.f32 1e-12, %v1823_v56 }
 0x2fb   :  { %1925 = vst.msk [vmem:[%s3335_s4 + $0x58] sm:$0xff] %vm3497_vm0, %v1908_v7  ;;  %v1862_v16 = vsub.f32 %v1814_v28, %v1846_v49  ;;  %v924_v7 = vadd.f32 %v908_v30, %v876_v46  ;;  %v910_v49 = vmul.f32 %v3129_v17, %v3508_v54 }
 0x2fc   :  { %1921 = vst.msk [vmem:[%s3335_s4 + $0x38] sm:$0xff] %vm3538_vm12, %v1904_v13  ;;  %v2216_v39 = vpop.eup %2215  ;;  %v878_v13 = vld [vmem:[#allocation4 + $0x60] sm:$0xff] }
 0x2fd   :  { %v1910_v35 = vmul.f32 %v2214_v26, %v1862_v16 }
 0x2fe   :  { %v2218_v44 = vpop.eup %2217 }
 0x2ff   :  { %v1816_v41 = vld [vmem:[#allocation4 + $0x78] sm:$0xff]  ;;  %1927 = vst.msk [vmem:[%s3335_s4 + $0x68] sm:$0xff] %vm3539_vm15, %v1910_v35  ;;  %v759_v53 = vmul.f32 %v2218_v44, %v743_v24  ;;  %v2220_v10 = vpop.eup %2219  ;;  %v1877_v35 = vadd.f32 1e-12, %v1829_v4 }
 0x300   :  { %v1864_v23 = vsub.f32 %v1816_v41, %v1848_v52  ;;  %v767_v32 = vmul.f32 %v2220_v10, %v751_v33  ;;  %v2222_v50 = vpop.eup %2221  ;;  %v926_v52 = vadd.f32 %v910_v49, %v878_v13  ;;  %v912_v41 = vmul.f32 %v3134_v22, %v3292_v63 }
 0x301   :  { %v1786_v28 = vmul.f32 0.6931472, %v2222_v50  ;;  %v2224_v26 = vpop.eup %2223 }
 0x302   :  { %v1912_v45 = vmul.f32 %v2216_v39, %v1864_v23  ;;  %v1831_v23 = vld [vmem:[#allocation5 + $0x70] sm:$0xff]  ;;  %v1790_v17 = vmul.f32 0.6931472, %v2224_v26 }
 0x303   :  { %v1841_v54 = vmul.f32 %v1825_v43, %v1786_v28  ;;  %v2226_v58 = vpop.eup %2225  ;;  %v1879_v6 = vadd.f32 1e-12, %v1831_v23 }
 0x304   :  { %1929 = vst.msk [vmem:[%s3335_s4 + $0x78] sm:$0xff] %vm3540_vm2, %v1912_v45  ;;  %v880_v45 = vld [vmem:[#allocation4 + $0x70] sm:$0xff]  ;;  %v1843_v63 = vmul.f32 %v1827_v36, %v1790_v17 }
 0x305   :  { %v928_v48 = vadd.f32 %v912_v41, %v880_v45 }
 0x31e   :  { %v782_v5 = vpop.xlane.xlu1 %781 }
 0x31f   :  { %v807_v62 = vadd.f32 %v782_v5, %v759_v53  ;;  %v1794_v53 = vmul.f32 0.6931472, %v2226_v58 }
 0x321   :  { %824 = vst.msk [vmem:[#allocation3 + $0x30] sm:$0xff] %vm3545_vm9, %v807_v62  ;;  %v1845_v2 = vmul.f32 %v1829_v4, %v1794_v53 }
 0x322   :  { %v798_v55 = vpop.xlane.xlu1 %797 }
 0x323   :  { %v815_v27 = vadd.f32 %v798_v55, %v767_v32 }
 0x325   :  { %832 = vst.msk [vmem:[#allocation3 + $0x70] sm:$0xff] %vm3546_vm13, %v815_v27 }
 0x326   :  { %v959_v51 = vpop.xlane.xlu1 %958 }
 0x327   :  { %v984_v29 = vadd.f32 %v959_v51, %v920_v38 }
 0x328   :  { %v1743_v60 = vld [vmem:[#allocation3 + $0x30] sm:$0xff] }
 0x329   :  { %v1759_v15 = vadd.f32 1e-12, %v1743_v60  ;;  %1000 = vst.msk [vmem:[#allocation4 + $0x30] sm:$0xff] %vm3547_vm14, %v984_v29 }
 0x32a   :  { %v963_v40 = vpop.xlane.xlu1 %962 }
 0x32b   :  { %2227 = vlog2.f32 %v1759_v15  ;;  %v986_v8 = vadd.f32 %v963_v40, %v922_v9 }
 0x32c   :  { %v1751_v34 = vld [vmem:[#allocation3 + $0x70] sm:$0xff]  ;;  %2229 = vrcp.f32 %v1873_v11 }
 0x32d   :  { %v1767_v14 = vadd.f32 1e-12, %v1751_v34  ;;  %1002 = vst.msk [vmem:[#allocation4 + $0x40] sm:$0xff] %vm3548_vm1, %v986_v8 }
 0x32e   :  { %v967_v20 = vpop.xlane.xlu1 %966 }
 0x32f   :  { %2231 = vlog2.f32 %v1767_v14  ;;  %v988_v16 = vadd.f32 %v967_v20, %v924_v7 }
 0x330   :  { %2233 = vrcp.f32 %v1875_v21  ;;  %v1807_v31 = vld [vmem:[#allocation4 + $0x30] sm:$0xff] }
 0x331   :  { %2235 = vrcp.f32 %v1871_v0  ;;  %1004 = vst.msk [vmem:[#allocation4 + $0x50] sm:$0xff] %vm3549_vm3, %v988_v16 }
 0x332   :  { %v971_v39 = vpop.xlane.xlu1 %970  ;;  %2237 = vrcp.f32 %v1877_v35 }
 0x333   :  { %v990_v25 = vadd.f32 %v971_v39, %v926_v52  ;;  %2239 = vrcp.f32 %v1879_v6 }
 0x334   :  { %v1809_v18 = vld [vmem:[#allocation4 + $0x40] sm:$0xff] }
 0x335   :  { %v2228_v47 = vpop.eup %2227  ;;  %v1857_v3 = vsub.f32 %v1809_v18, %v1841_v54  ;;  %1006 = vst.msk [vmem:[#allocation4 + $0x60] sm:$0xff] %vm3550_vm11, %v990_v25 }
 0x336   :  { %v2230_v44 = vpop.eup %2229  ;;  %v1782_v24 = vmul.f32 0.6931472, %v2228_v47  ;;  %v975_v19 = vpop.xlane.xlu1 %974 }
 0x337   :  { %v1905_v22 = vmul.f32 %v2230_v44, %v1857_v3  ;;  %v992_v10 = vadd.f32 %v975_v19, %v928_v48 }
 0x338   :  { %v1839_v12 = vmul.f32 %v1823_v56, %v1782_v24  ;;  %v1811_v5 = vld [vmem:[#allocation4 + $0x50] sm:$0xff] }
 0x339   :  { %v2232_v33 = vpop.eup %2231  ;;  %1922 = vst.msk [vmem:[%s3335_s4 + $0x40] sm:$0xff] %vm3551_vm8, %v1905_v22  ;;  %v1859_v62 = vsub.f32 %v1811_v5, %v1843_v63 }
 0x33a   :  { %1008 = vst.msk [vmem:[#allocation4 + $0x70] sm:$0xff] %vm3552_vm10, %v992_v10  ;;  %v2234_v32 = vpop.eup %2233  ;;  %v1855_v59 = vsub.f32 %v1807_v31, %v1839_v12  ;;  %v1798_v55 = vmul.f32 0.6931472, %v2232_v33 }
 0x33b   :  { %v2236_v42 = vpop.eup %2235  ;;  %v1907_v57 = vmul.f32 %v2234_v32, %v1859_v62 }
 0x33c   :  { %v1903_v27 = vmul.f32 %v2236_v42, %v1855_v59  ;;  %v1813_v38 = vld [vmem:[#allocation4 + $0x60] sm:$0xff]  ;;  %v2238_v43 = vpop.eup %2237  ;;  %v1847_v51 = vmul.f32 %v1831_v23, %v1798_v55 }
 0x33d   :  { %1924 = vst.msk [vmem:[%s3335_s4 + $0x50] sm:$0xff] %vm3553_vm7, %v1907_v57  ;;  %v1861_v61 = vsub.f32 %v1813_v38, %v1845_v2  ;;  %v2240_v60 = vpop.eup %2239 }
 0x33e   :  { %1920 = vst.msk [vmem:[%s3335_s4 + $0x30] sm:$0xff] %vm3554_vm5, %v1903_v27 }
 0x33f   :  { %v1909_v1 = vmul.f32 %v2238_v43, %v1861_v61 }
 0x341   :  { %v1815_v37 = vld [vmem:[#allocation4 + $0x70] sm:$0xff]  ;;  %1926 = vst.msk [vmem:[%s3335_s4 + $0x60] sm:$0xff] %vm3555_vm4, %v1909_v1 }
 0x342   :  { %v1863_v29 = vsub.f32 %v1815_v37, %v1847_v51 }
 0x344   :  { %v1911_v11 = vmul.f32 %v2240_v60, %v1863_v29 }
 0x346   :  { %1928 = vst.msk [vmem:[%s3335_s4 + $0x70] sm:$0xff] %vm3556_vm6, %v1911_v11 }
 0x347   :  { %1934 = vsyncpa [#allocation7], 1 }

</bundles_post_ra>
